<compile_context>
chip_gen: v6e
topology: v6e:2x2x1
jax: 0.10.0
libtpu: 0.0.40
codegen_flags: <defaults>
</compile_context>

<pallas_src>
import functools
import math

import jax
import jax.numpy as jnp
from jax.experimental import pallas as pl
from jax.experimental.pallas import tpu as pltpu


def _self_attention_kernel(x_ref, wfh_ref, bfh_ref, wg_ref, bg_ref, gamma_ref,
                           o_ref, xbf_scr, g_scr, *, ti, n_it, cf_pad,
                           n_valid, n_pad):
    # x_ref: (1, C, N_pad) f32      wfh_ref: (Cf_pad + C, C) bf16
    # bfh_ref: (Cf_pad + C, 1) f32  wg_ref: (Cf_pad, C) bf16   bg_ref: (Cf_pad, 1) f32
    # gamma_ref: (1,) f32 in SMEM   o_ref: (1, C, N_pad) f32 (resident accumulator)
    # xbf_scr: (n_it, C, TI) bf16   g_scr: (Cf_pad, N_pad) bf16
    it = pl.program_id(1)

    # ---- once per batch: single pass over x (residual pre-load of the output,
    # bf16 copy of x for the query tiles, and g = Wg @ x + bg), done per
    # lane-aligned TI-column block with static offsets. ----
    @pl.when(it == 0)
    def _init():
        for k in range(n_it):  # static unroll
            x_blk = x_ref[0, :, pl.ds(k * ti, ti)]                 # (C, TI) f32
            o_ref[0, :, pl.ds(k * ti, ti)] = x_blk                 # out := x
            x_bf = x_blk.astype(jnp.bfloat16)
            xbf_scr[k] = x_bf
            g_blk = jnp.dot(wg_ref[...], x_bf,
                            preferred_element_type=jnp.float32) + bg_ref[...]
            g_scr[:, pl.ds(k * ti, ti)] = g_blk.astype(jnp.bfloat16)

    # ---- fused f/h projection for this query tile (one MXU pass) ----
    x_i = xbf_scr[it]                                              # (C, TI) bf16
    fh = jnp.dot(wfh_ref[...], x_i,
                 preferred_element_type=jnp.float32) + bfh_ref[...]
    f_i = fh[:cf_pad, :]                                           # (Cf_pad, TI)
    h_i = fh[cf_pad:, :]                                           # (C, TI)

    # logits[i, j] = sum_c f[c, i] * g[c, j]  -> (TI, N_pad)
    f_t = jnp.transpose(f_i).astype(jnp.bfloat16)                  # (TI, Cf_pad)
    logits = jnp.dot(f_t, g_scr[...],
                     preferred_element_type=jnp.float32)           # (TI, N_pad) f32

    if n_valid != n_pad:  # mask padded key columns before the softmax
        col = jax.lax.broadcasted_iota(jnp.int32, (1, n_pad), 1)
        logits = jnp.where(col < n_valid, logits, -1e30)

    # Softmax over j (dim=-1), full row present so no online rescaling.  The
    # 1/sum (EUP reciprocal) and gamma are folded into the small (C, TI) h tile
    # instead of the large (TI, N) probability block.
    m = jnp.max(logits, axis=-1, keepdims=True)                    # (TI, 1)
    e = jnp.exp(logits - m)                                        # (TI, N_pad) f32
    r = pl.reciprocal(jnp.sum(e, axis=-1, keepdims=True), approx=True)  # (TI, 1)
    p = e.astype(jnp.bfloat16)                                     # (TI, N_pad)

    scale = gamma_ref[0] * jnp.transpose(r)                        # (1, TI)
    h_s = h_i * scale                                              # (C, TI) f32
    if n_valid != n_pad:  # zero contributions of padded query positions
        row = jax.lax.broadcasted_iota(jnp.int32, (1, ti), 1) + it * ti
        h_s = jnp.where(row < n_valid, h_s, 0.0)

    # out[:, j] += sum_i gamma * (h[:, i] / l_i) * e[i, j]
    o_ref[0] += jnp.dot(h_s.astype(jnp.bfloat16), p,
                        preferred_element_type=jnp.float32)


def self_attention(x, wf, bf, wg, bg, wh, bh, gamma, *, query_tile=256):
    """x: (B, C, W, H) NCHW float32. Returns (B, C, W, H)."""
    B, C, W, H = x.shape
    N = W * H
    Cf = wf.shape[0]
    if C % 8 != 0:
        raise ValueError("C must be a multiple of 8 for this kernel")

    # Pad the f/g channel dim to a multiple of 16 (bf16 native sublane tile).
    # Padded rows are all-zero, so they contribute exactly 0 to the logits.
    Cf_pad = max(16, ((Cf + 15) // 16) * 16)
    if Cf_pad != Cf:
        pad = Cf_pad - Cf
        wf = jnp.concatenate([wf, jnp.zeros((pad, C), wf.dtype)], axis=0)
        wg = jnp.concatenate([wg, jnp.zeros((pad, C), wg.dtype)], axis=0)
        bf = jnp.concatenate([bf, jnp.zeros((pad,), bf.dtype)], axis=0)
        bg = jnp.concatenate([bg, jnp.zeros((pad,), bg.dtype)], axis=0)

    # Pad N up to a lane multiple (masked in-kernel) instead of falling back to
    # a full (N, N) logits block.
    N_pad = max(128, ((N + 127) // 128) * 128)

    TI = query_tile
    if TI % 128 != 0 or N_pad % TI != 0:
        TI = 128
    n_it = N_pad // TI

    x_flat = x.reshape(B, C, N).astype(jnp.float32)
    if N_pad != N:
        x_flat = jnp.pad(x_flat, ((0, 0), (0, 0), (0, N_pad - N)))

    # Fused f/h projection weight; weights pre-cast to bf16, biases stay f32.
    w_fh = jnp.concatenate([wf, wh], axis=0).astype(jnp.bfloat16)
    b_fh = jnp.concatenate([bf, bh], axis=0).astype(jnp.float32).reshape(-1, 1)
    wg_b = wg.astype(jnp.bfloat16)
    bg_c = bg.astype(jnp.float32).reshape(-1, 1)

    kernel = functools.partial(
        _self_attention_kernel, ti=TI, n_it=n_it, cf_pad=Cf_pad,
        n_valid=N, n_pad=N_pad)

    # VMEM budget (bytes): resident x / output blocks (pipeline double-buffered),
    # bf16 scratches, params, and per-step (TI, N_pad) temporaries.
    est = (4 * 2 * C * N_pad           # x input block
           + 4 * 2 * C * N_pad         # output block (resident accumulator)
           + 2 * n_it * C * TI         # bf16 x scratch
           + 2 * Cf_pad * N_pad        # bf16 g scratch
           + 2 * ((Cf_pad + C) * C + Cf_pad * C)   # bf16 weights
           + 4 * (Cf_pad + 2 * C)                  # biases
           + 4 * 3 * TI * N_pad                    # logits / e / p temporaries
           + 4 * 4 * (Cf_pad + C) * TI)            # fh / f / h tiles
    try:  # generation-aware cap (v7x: 64 MiB physical VMEM; v5e/v6e: 128 MiB)
        cap = int(pltpu.get_tpu_info().vmem_capacity_bytes)
    except Exception:
        cap = 64 << 20
    vmem_limit = int(min(max(2 * est, 16 << 20), max((cap * 3) // 4, 16 << 20)))

    out_flat = pl.pallas_call(
        kernel,
        out_shape=jax.ShapeDtypeStruct((B, C, N_pad), jnp.float32),
        grid_spec=pltpu.PrefetchScalarGridSpec(
            num_scalar_prefetch=0,
            grid=(B, n_it),
            in_specs=[
                pl.BlockSpec((1, C, N_pad), lambda b, i: (b, 0, 0)),    # x
                pl.BlockSpec((Cf_pad + C, C), lambda b, i: (0, 0)),     # [Wf; Wh]
                pl.BlockSpec((Cf_pad + C, 1), lambda b, i: (0, 0)),     # [bf; bh]
                pl.BlockSpec((Cf_pad, C), lambda b, i: (0, 0)),         # Wg
                pl.BlockSpec((Cf_pad, 1), lambda b, i: (0, 0)),         # bg
                pl.BlockSpec(memory_space=pltpu.MemorySpace.SMEM),      # gamma
            ],
            out_specs=pl.BlockSpec((1, C, N_pad), lambda b, i: (b, 0, 0)),
            scratch_shapes=[
                pltpu.VMEM((n_it, C, TI), jnp.bfloat16),    # bf16 x query tiles
                pltpu.VMEM((Cf_pad, N_pad), jnp.bfloat16),  # g over all positions
            ],
        ),
        compiler_params=pltpu.CompilerParams(
            dimension_semantics=("parallel", "arbitrary"),
            vmem_limit_bytes=vmem_limit,
        ),
    )(x_flat, w_fh, b_fh, wg_b, bg_c,
      jnp.reshape(gamma, (1,)).astype(jnp.float32))

    out = out_flat[:, :, :N] if N_pad != N else out_flat
    return out.reshape(B, C, W, H).astype(x.dtype)


def self_attention_reference(x, wf, bf, wg, bg, wh, bh, gamma):
    """Pure-JAX f32 reference mirroring the PyTorch forward."""
    B, C, W, H = x.shape
    N = W * H
    xf = x.reshape(B, C, N)
    f = jnp.einsum('oc,bcn->bon', wf, xf) + bf[None, :, None]
    g = jnp.einsum('oc,bcn->bon', wg, xf) + bg[None, :, None]
    h = jnp.einsum('oc,bcn->bon', wh, xf) + bh[None, :, None]
    attn = jax.nn.softmax(jnp.einsum('bci,bcj->bij', f, g), axis=-1)
    sa = jnp.einsum('bci,bij->bcj', h, attn)
    return (gamma.reshape(()) * sa + xf).reshape(B, C, W, H)


def xavier_uniform(key, out_c, in_c):
    # Conv2d weight (out, in, 1, 1): fan_in = in, fan_out = out.
    bound = math.sqrt(6.0 / (in_c + out_c))
    return jax.random.uniform(key, (out_c, in_c), jnp.float32, -bound, bound)


if __name__ == "__main__":
    key = jax.random.PRNGKey(0)
    B, C, W, H = 2, 32, 16, 16
    Cf = C // 8

    k = jax.random.split(key, 8)
    x = jax.random.normal(k[0], (B, C, W, H), dtype=jnp.float32)
    wf = xavier_uniform(k[1], Cf, C)
    wg = xavier_uniform(k[2], Cf, C)
    wh = xavier_uniform(k[3], C, C)
    # Non-zero biases so the padded-N masking path is actually exercised.
    bf = 0.1 * jax.random.normal(k[4], (Cf,), dtype=jnp.float32)
    bg = 0.1 * jax.random.normal(k[5], (Cf,), dtype=jnp.float32)
    bh = 0.1 * jax.random.normal(k[6], (C,), dtype=jnp.float32)
    gamma0 = jnp.zeros((1,), jnp.float32)   # module __init__: gamma = 0

    # Module init (gamma = 0): output is exactly the residual x.
    out = jax.block_until_ready(self_attention(x, wf, bf, wg, bg, wh, bh, gamma0))
    assert jnp.allclose(out, x, atol=1e-5), "gamma=0 residual path mismatch"

    # Full attention path, nonzero gamma, vs f32 reference (bf16 MXU operands with
    # f32 accumulation -> loosened tolerance).  TI=256 (single query tile) and
    # TI=128 (two accumulated query tiles) both checked.
    gamma_nz = jnp.asarray([0.5], jnp.float32)
    ref_nz = self_attention_reference(x, wf, bf, wg, bg, wh, bh, gamma_nz)
    out_nz = jax.block_until_ready(
        self_attention(x, wf, bf, wg, bg, wh, bh, gamma_nz))
    assert jnp.allclose(out_nz, ref_nz, atol=7e-2, rtol=7e-2), \
        "kernel vs reference mismatch (TI=256)"
    out_nz_t = jax.block_until_ready(
        self_attention(x, wf, bf, wg, bg, wh, bh, gamma_nz, query_tile=128))
    assert jnp.allclose(out_nz_t, ref_nz, atol=7e-2, rtol=7e-2), \
        "kernel vs reference mismatch (TI=128, multi-tile accumulation)"

    # Non-128-multiple spatial size (N = 10*10 = 100 -> padded to 128, masked).
    x2 = jax.random.normal(k[7], (B, C, 10, 10), dtype=jnp.float32)
    ref2 = self_attention_reference(x2, wf, bf, wg, bg, wh, bh, gamma_nz)
    out2 = jax.block_until_ready(
        self_attention(x2, wf, bf, wg, bg, wh, bh, gamma_nz))
    assert jnp.allclose(out2, ref2, atol=7e-2, rtol=7e-2), \
        "kernel vs reference mismatch (padded N)"

    print("KERNEL_OK")
</pallas_src>

<mosaic_0001>
module attributes {stable_mosaic.version = 11 : i64} {
  func.func @_self_attention_kernel(%arg0: i32, %arg1: i32, %arg2: memref<1x32x256xf32, #tpu.memory_space<vmem>>, %arg3: memref<48x32xbf16, #tpu.memory_space<vmem>>, %arg4: memref<48x1xf32, #tpu.memory_space<vmem>>, %arg5: memref<16x32xbf16, #tpu.memory_space<vmem>>, %arg6: memref<16x1xf32, #tpu.memory_space<vmem>>, %arg7: memref<1xf32, #tpu.memory_space<smem>>, %arg8: memref<1x32x256xf32, #tpu.memory_space<vmem>>, %arg9: memref<1x32x256xbf16, #tpu.memory_space<vmem>>, %arg10: memref<16x256xbf16, #tpu.memory_space<vmem>>) attributes {dimension_semantics = [#tpu.dimension_semantics<parallel>, #tpu.dimension_semantics<arbitrary>], iteration_bounds = array<i64: 2, 1>, scalar_prefetch = 0 : i64, scratch_operands = 2 : i64, tpu.core_type = #tpu.core_type<tc>, window_params = [{transform_indices = @transform_0, window_bounds = array<i64: 1, 32, 256>}, {pipeline_mode = #tpu.pipeline_mode<synchronous>, transform_indices = @transform_1, window_bounds = array<i64: 48, 32>}, {pipeline_mode = #tpu.pipeline_mode<synchronous>, transform_indices = @transform_2, window_bounds = array<i64: 48, 1>}, {pipeline_mode = #tpu.pipeline_mode<synchronous>, transform_indices = @transform_3, window_bounds = array<i64: 16, 32>}, {pipeline_mode = #tpu.pipeline_mode<synchronous>, transform_indices = @transform_4, window_bounds = array<i64: 16, 1>}, {transform_indices = @transform_5, window_bounds = array<i64: 1>}, {transform_indices = @transform_6, window_bounds = array<i64: 1, 32, 256>}]} {
    %c0_i32 = arith.constant 0 : i32
    %0 = arith.cmpi eq, %arg1, %c0_i32 : i32
    %1 = arith.extui %0 : i1 to i32
    %c0_i32_0 = arith.constant 0 : i32
    %2 = arith.cmpi ne, %1, %c0_i32_0 : i32
    scf.if %2 {
      %c0_19 = arith.constant 0 : index
      %c0_20 = arith.constant 0 : index
      %c0_21 = arith.constant 0 : index
      %40 = vector.load %arg2[%c0_19, %c0_20, %c0_21] : memref<1x32x256xf32, #tpu.memory_space<vmem>>, vector<1x32x256xf32>
      %41 = vector.shape_cast %40 : vector<1x32x256xf32> to vector<32x256xf32>
      %c0_22 = arith.constant 0 : index
      %c0_23 = arith.constant 0 : index
      %c0_24 = arith.constant 0 : index
      %42 = vector.load %arg8[%c0_22, %c0_23, %c0_24] : memref<1x32x256xf32, #tpu.memory_space<vmem>>, vector<1x32x256xf32>
      %43 = vector.shape_cast %42 : vector<1x32x256xf32> to vector<32x256xf32>
      %44 = vector.shape_cast %41 : vector<32x256xf32> to vector<1x32x256xf32>
      tpu.vector_store %arg8[%c0_22, %c0_23, %c0_24], %44 {strides = array<i32>} : memref<1x32x256xf32, #tpu.memory_space<vmem>>, vector<1x32x256xf32>,
      %45 = arith.truncf %41 : vector<32x256xf32> to vector<32x256xbf16>
      %c0_25 = arith.constant 0 : index
      %c0_26 = arith.constant 0 : index
      %c0_27 = arith.constant 0 : index
      %46 = vector.load %arg9[%c0_25, %c0_26, %c0_27] : memref<1x32x256xbf16, #tpu.memory_space<vmem>>, vector<1x32x256xbf16>
      %47 = vector.shape_cast %46 : vector<1x32x256xbf16> to vector<32x256xbf16>
      %48 = vector.shape_cast %45 : vector<32x256xbf16> to vector<1x32x256xbf16>
      tpu.vector_store %arg9[%c0_25, %c0_26, %c0_27], %48 {strides = array<i32>} : memref<1x32x256xbf16, #tpu.memory_space<vmem>>, vector<1x32x256xbf16>,
      %c0_28 = arith.constant 0 : index
      %c0_29 = arith.constant 0 : index
      %49 = vector.load %arg5[%c0_28, %c0_29] : memref<16x32xbf16, #tpu.memory_space<vmem>>, vector<16x32xbf16>
      %cst_30 = arith.constant dense<0.000000e+00> : vector<16x256xf32>
      %50 = tpu.matmul %49, %45, %cst_30 {dimension_numbers = #tpu.dot_dimension_numbers<[1], [0], [0], [1], [0, 0, 1, 1], [], []>} : vector<16x32xbf16>, vector<32x256xbf16>, vector<16x256xf32> -> vector<16x256xf32>
      %c0_31 = arith.constant 0 : index
      %c0_32 = arith.constant 0 : index
      %51 = vector.load %arg6[%c0_31, %c0_32] : memref<16x1xf32, #tpu.memory_space<vmem>>, vector<16x1xf32>
      %52 = vector.broadcast %51 : vector<16x1xf32> to vector<16x256xf32>
      %53 = arith.addf %50, %52 : vector<16x256xf32>
      %54 = arith.truncf %53 : vector<16x256xf32> to vector<16x256xbf16>
      %c0_33 = arith.constant 0 : index
      %c0_34 = arith.constant 0 : index
      %55 = vector.load %arg10[%c0_33, %c0_34] : memref<16x256xbf16, #tpu.memory_space<vmem>>, vector<16x256xbf16>
      tpu.vector_store %arg10[%c0_33, %c0_34], %54 {strides = array<i32>} : memref<16x256xbf16, #tpu.memory_space<vmem>>, vector<16x256xbf16>,
    } else {
    }
    %3 = arith.index_cast %arg1 : i32 to index
    %c0 = arith.constant 0 : index
    %c0_1 = arith.constant 0 : index
    %4 = vector.load %arg9[%3, %c0, %c0_1] : memref<1x32x256xbf16, #tpu.memory_space<vmem>>, vector<1x32x256xbf16>
    %5 = vector.shape_cast %4 : vector<1x32x256xbf16> to vector<32x256xbf16>
    %c0_2 = arith.constant 0 : index
    %c0_3 = arith.constant 0 : index
    %6 = vector.load %arg3[%c0_2, %c0_3] : memref<48x32xbf16, #tpu.memory_space<vmem>>, vector<48x32xbf16>
    %cst = arith.constant dense<0.000000e+00> : vector<48x256xf32>
    %7 = tpu.matmul %6, %5, %cst {dimension_numbers = #tpu.dot_dimension_numbers<[1], [0], [0], [1], [0, 0, 1, 1], [], []>} : vector<48x32xbf16>, vector<32x256xbf16>, vector<48x256xf32> -> vector<48x256xf32>
    %c0_4 = arith.constant 0 : index
    %c0_5 = arith.constant 0 : index
    %8 = vector.load %arg4[%c0_4, %c0_5] : memref<48x1xf32, #tpu.memory_space<vmem>>, vector<48x1xf32>
    %9 = vector.broadcast %8 : vector<48x1xf32> to vector<48x256xf32>
    %10 = arith.addf %7, %9 : vector<48x256xf32>
    %11 = vector.extract_strided_slice %10 {offsets = [0, 0], sizes = [16, 256], strides = [1, 1]} : vector<48x256xf32> to vector<16x256xf32>
    %12 = vector.extract_strided_slice %10 {offsets = [16, 0], sizes = [32, 256], strides = [1, 1]} : vector<48x256xf32> to vector<32x256xf32>
    %13 = tpu.transpose %11, [1, 0] : vector<16x256xf32> -> vector<256x16xf32>
    %14 = arith.truncf %13 : vector<256x16xf32> to vector<256x16xbf16>
    %c0_6 = arith.constant 0 : index
    %c0_7 = arith.constant 0 : index
    %15 = vector.load %arg10[%c0_6, %c0_7] : memref<16x256xbf16, #tpu.memory_space<vmem>>, vector<16x256xbf16>
    %cst_8 = arith.constant dense<0.000000e+00> : vector<256x256xf32>
    %16 = tpu.matmul %14, %15, %cst_8 {dimension_numbers = #tpu.dot_dimension_numbers<[1], [0], [0], [1], [0, 0, 1, 1], [], []>} : vector<256x16xbf16>, vector<16x256xbf16>, vector<256x256xf32> -> vector<256x256xf32>
    %cst_9 = arith.constant dense<0xFF800000> : vector<256xf32>
    %17 = vector.multi_reduction <maximumf>, %16, %cst_9 [1] : vector<256x256xf32> to vector<256xf32>
    %18 = vector.shape_cast %17 : vector<256xf32> to vector<256x1xf32>
    %19 = vector.broadcast %18 : vector<256x1xf32> to vector<256x256xf32>
    %20 = arith.subf %16, %19 : vector<256x256xf32>
    %21 = math.exp %20 : vector<256x256xf32>
    %cst_10 = arith.constant dense<0.000000e+00> : vector<256xf32>
    %22 = vector.multi_reduction <add>, %21, %cst_10 [1] : vector<256x256xf32> to vector<256xf32>
    %23 = vector.shape_cast %22 : vector<256xf32> to vector<256x1xf32>
    %24 = tpu.reciprocal %23 {approx = true} : vector<256x1xf32> -> vector<256x1xf32>
    %25 = arith.truncf %21 : vector<256x256xf32> to vector<256x256xbf16>
    %c0_11 = arith.constant 0 : index
    %26 = memref.load %arg7[%c0_11] : memref<1xf32, #tpu.memory_space<smem>>
    %27 = tpu.transpose %24, [1, 0] : vector<256x1xf32> -> vector<1x256xf32>
    %28 = vector.broadcast %26 : f32 to vector<1x256xf32>
    %29 = arith.mulf %28, %27 : vector<1x256xf32>
    %30 = vector.broadcast %29 : vector<1x256xf32> to vector<32x256xf32>
    %31 = arith.mulf %12, %30 : vector<32x256xf32>
    %c0_12 = arith.constant 0 : index
    %c0_13 = arith.constant 0 : index
    %c0_14 = arith.constant 0 : index
    %32 = vector.load %arg8[%c0_12, %c0_13, %c0_14] : memref<1x32x256xf32, #tpu.memory_space<vmem>>, vector<1x32x256xf32>
    %33 = vector.shape_cast %32 : vector<1x32x256xf32> to vector<32x256xf32>
    %34 = arith.truncf %31 : vector<32x256xf32> to vector<32x256xbf16>
    %cst_15 = arith.constant dense<0.000000e+00> : vector<32x256xf32>
    %35 = tpu.matmul %34, %25, %cst_15 {dimension_numbers = #tpu.dot_dimension_numbers<[1], [0], [0], [1], [0, 0, 1, 1], [], []>} : vector<32x256xbf16>, vector<256x256xbf16>, vector<32x256xf32> -> vector<32x256xf32>
    %36 = arith.addf %33, %35 : vector<32x256xf32>
    %c0_16 = arith.constant 0 : index
    %c0_17 = arith.constant 0 : index
    %c0_18 = arith.constant 0 : index
    %37 = vector.load %arg8[%c0_16, %c0_17, %c0_18] : memref<1x32x256xf32, #tpu.memory_space<vmem>>, vector<1x32x256xf32>
    %38 = vector.shape_cast %37 : vector<1x32x256xf32> to vector<32x256xf32>
    %39 = vector.shape_cast %36 : vector<32x256xf32> to vector<1x32x256xf32>
    tpu.vector_store %arg8[%c0_16, %c0_17, %c0_18], %39 {strides = array<i32>} : memref<1x32x256xf32, #tpu.memory_space<vmem>>, vector<1x32x256xf32>,
    return
  }
  func.func @transform_0(%arg0: i32, %arg1: i32) -> (i32, i32, i32) {
    %c0_i32 = arith.constant 0 : i32
    %c0_i32_0 = arith.constant 0 : i32
    %c0_i32_1 = arith.constant 0 : i32
    return %arg0, %c0_i32, %c0_i32_0 : i32, i32, i32
  }
  func.func @transform_1(%arg0: i32, %arg1: i32) -> (i32, i32) {
    %c0_i32 = arith.constant 0 : i32
    %c0_i32_0 = arith.constant 0 : i32
    %c0_i32_1 = arith.constant 0 : i32
    return %c0_i32, %c0_i32_0 : i32, i32
  }
  func.func @transform_2(%arg0: i32, %arg1: i32) -> (i32, i32) {
    %c0_i32 = arith.constant 0 : i32
    %c0_i32_0 = arith.constant 0 : i32
    %c0_i32_1 = arith.constant 0 : i32
    return %c0_i32, %c0_i32_0 : i32, i32
  }
  func.func @transform_3(%arg0: i32, %arg1: i32) -> (i32, i32) {
    %c0_i32 = arith.constant 0 : i32
    %c0_i32_0 = arith.constant 0 : i32
    %c0_i32_1 = arith.constant 0 : i32
    return %c0_i32, %c0_i32_0 : i32, i32
  }
  func.func @transform_4(%arg0: i32, %arg1: i32) -> (i32, i32) {
    %c0_i32 = arith.constant 0 : i32
    %c0_i32_0 = arith.constant 0 : i32
    %c0_i32_1 = arith.constant 0 : i32
    return %c0_i32, %c0_i32_0 : i32, i32
  }
  func.func @transform_5(%arg0: i32, %arg1: i32) -> i32 {
    %c0_i32 = arith.constant 0 : i32
    %c0_i32_0 = arith.constant 0 : i32
    return %c0_i32 : i32
  }
  func.func @transform_6(%arg0: i32, %arg1: i32) -> (i32, i32, i32) {
    %c0_i32 = arith.constant 0 : i32
    %c0_i32_0 = arith.constant 0 : i32
    %c0_i32_1 = arith.constant 0 : i32
    return %arg0, %c0_i32, %c0_i32_0 : i32, i32, i32
  }
}

</mosaic_0001>

<bundles_post_ra>
// kernel: tpu_custom_call.1
= control target key start
LH: loop header
LB: loop body
LE: loop exit
PB: predicated region body
PF: predicated region fallthrough
CT: control target
= control target key end

     0   :  { %s2834_s0 = inlined_call_operand.hbm [shape: f32[2,32,256], index: 0, kind: input, shape index: {}]   ;;  %s2835_s1 = inlined_call_operand.vmem [shape: bf16[48,32], index: 1, kind: input, shape index: {}]   ;;  %s2836_s2 = inlined_call_operand.vmem [shape: f32[48,1], index: 2, kind: input, shape index: {}]   ;;  %s2837_s3 = inlined_call_operand.vmem [shape: bf16[16,32], index: 3, kind: input, shape index: {}]   ;;  %s2838_s4 = inlined_call_operand.vmem [shape: f32[16,1], index: 4, kind: input, shape index: {}]   ;;  %s2839_s5 = inlined_call_operand.<no memory space> [shape: f32[1], index: 5, kind: input, shape index: {}]   ;;  %s2840_s6 = inlined_call_operand.hbm [shape: f32[2,32,256], index: 6, kind: output, shape index: {}]  }
   0x1   :  { %11 = sst [smem:[#allocation4]] %s2839_s5 }
   0x2   :  { %12 = vsyncpa [#allocation6], 0 }
   0x3   :  { %14 = vsyncpa [#allocation6 + $0x1], 0 }
   0x4   :  { %15 = vsyncpa [#allocation7], 0 }
   0x5   :  { %17 = vsyncpa [#allocation7 + $0x1], 0  ;;  %s2099_s23 = smov 0   ;;  %s2101_s24 = smov 0  }
   0x6   :  { %s2103_s25 = smov 0   ;;  %s2105_s26 = smov 0  }
   0x7   :  { %s2107_s27 = smov 0   ;;  %s2109_s28 = smov 0  }
   0x8 LB: > { %s1613_s5 = sadd.s32 4294967295, %s2052_s28   ;;  %s1614_s29 = sadd.s32 4294967294, %s2052_s28   ;;  %s2052_s28 = sphi %s2109_s28, %s23_s28   ;;  %s2048_s27 = sphi %s2107_s27, %s2896_s27   ;;  %s2044_s26 = sphi %s2105_s26, %s2895_s26   ;;  %s2040_s25 = sphi %s2103_s25, %s2894_s25   ;;  %s2036_s24 = sphi %s2101_s24, %s2893_s24   ;;  %s2032_s23 = sphi %s2099_s23, %s2892_s23  }
   0x9   : > { %s35_s30 = sadd.s32 1, %s2048_s27  ;;  %s42_s7 = sadd.s32 1, %s2040_s25 }
   0xa   : > { %p37_p0 = scmp.ge.s32.totalorder %s35_s30, 2  ;;  %p49_p1 = scmp.ne.s32.totalorder %s2040_s25, %s2036_s24 }
   0xb   : > { %p50_p2 = scmp.eq.s32.totalorder %s2052_s28, 0  ;;  %p55_p3 = scmp.ne.s32.totalorder %s2036_s24, %s2032_s23 }
   0xc   : > { %s2898_s30 = smov (%p37_p0, %s35_s30), 0  ;;  %p56_p5 = scmp.eq.s32.totalorder %s1613_s5, 0 }
   0xd   : > { %p2140_p4 = por %p50_p2, %p49_p1  ;;  %s39_s9 = ssub.s32 %s2048_s27, %s2898_s30 }
   0xe   : > { %p184_p6 = scmp.eq.s32.totalorder %s1613_s5, 1  ;;  %p40_p7 = scmp.eq.s32.totalorder %s39_s9, 0 }
   0xf   : > { %p2146_p8 = por %p56_p5, %p55_p3  ;;  %p190_p10 = scmp.eq.s32.totalorder %s1614_s29, 1 }
  0x10   : > { %p2150_p9 = por %p184_p6, %p49_p1  ;;  %p1690_p13 = scmp.lt.s32.totalorder %s2052_s28, 2 }
  0x11   : > { %s2155_s12 = scalar_select %p40_p7, %s2040_s25, %s42_s7  }
  0x12   : > { %p2157_p11 = por %p190_p10, %p55_p3  ;;  %s225_s14 = sand.u32 1, %s2040_s25  }
  0x13   : > { %s1617_s15 = sshll.u32 %s225_s14, 6  ;;  %s1664_s16 = sshll.u32 %s2048_s27, 10 }
  0x14   : > { %s235_s19 = scalar_lea.hbm %s2834_s0, %s1664_s16  ;;  %s229_s20 = scalar_lea.vmem [#allocation5], %s1617_s15 }
  0x15   : > { %s236_s21 = sshll.u32 %s229_s20, 4  ;;  %p2170_p0 = pnand %p1690_p13, %p2140_p4  ;;  %s237_s21 = int_to_ptr.vmem [resolvable:$true] %s236_s21 }
  0x16   : > { %p1620_p1 = scmp.ge.s32.totalorder %s2052_s28, 1  ;;  %s226_s5 = scalar_lea.sflag [#allocation6], %s225_s14 }
  0x17   : > { %p1946_p2 = pneg %p2170_p0  ;;  %s1957_s29 = scalar_lea.vmem %s237_s21, 1024 }
  0x18   : > { %p1958_p3 = scmp.ne.s32.totalorder %s237_s21, %s1957_s29  ;;  %s2054_s7 = smov [#allocation5]  }
  0x19   : > { %s1962_s9 = sshll.u32 %s2054_s7, 4  ;;  %s1963_s9 = int_to_ptr.vmem [resolvable:$false] %s1962_s9 }
  0x1a   : > { %p1960_p5 = pnand %p1958_p3, %p1946_p2  ;;  %s1964_s15 = scalar_lea.vmem %s1963_s9, 2048 }
  0x1b   : > { %p1965_p7 = scmp.lt.s32.totalorder %s237_s21, %s1963_s9  ;;  %p1966_p10 = scmp.lt.s32.totalorder %s1964_s15, %s1957_s29 }
  0x1c   : > { %p1961_p6 = pneg %p1960_p5 }
  0x1d   : > { %p1967_p12 = por %p1966_p10, %p1965_p7 }
  0x1f   : > { %p1968_p4 = pnand %p1967_p12, %p1961_p6 }
  0x21   : > { %1971 = shalt.err (!%p1968_p4)
}
  0x22   : > { %s2055_s8 = smov 256   ;;  %s2056_s14 = smov 16  }
  0x23   : > { %1685 = dma.hbm_to_vmem [thread:$0]  (!%p2170_p0), %s235_s19, 1024, %s237_s21, %s226_s5, %s2055_s8, %s2055_s8, %s2056_s14  }
  0x24   : > { %p244_p13 = scmp.lt.s32.totalorder %s2052_s28, 3 }
  0x26   : > { %p245_p2 = pnand %p1620_p1, %p244_p13 }
  0x28   : > { %248 = sbr.rel (%p245_p2) target bundleno = 1323 (0x52b), region = 44 }
  0x2d   : > { %s2183_s16 = sand.u32 1, %s2036_s24  }
  0x2e   : > { %s1621_s17 = sshll.u32 %s2183_s16, 6  ;;  %s251_s18 = scalar_lea.sflag [#allocation6], %s2183_s16 }
  0x2f   : > { %s254_s20 = scalar_lea.vmem [#allocation5], %s1621_s17 }
  0x30   : > { %2023 = dma.done.wait (%p2146_p8), %s251_s18, 1024  }
  0x31   : > { %2025 = vsyncadd (%p2146_p8), %s251_s18, 4294966272  ;;  %v2057_v0 = vmov 0   ;;  %v293_v1 = vld [vmem:[%s254_s20 + $0x28] sm:$0xff]  ;;  %v295_v2 = vld [vmem:[%s254_s20 + $0x38] sm:$0xff]  ;;  %s2195_s19 = scalar_lea.vmem [#allocation8], %s1621_s17  ;;  %vm351_vm0 = vcmask 261120  }
  0x32   : > { %387 = vmatprep.mubr.bf16.mxu1 %v2057_v0  ;;  %1747 = vset.pattern.permute.xlu1 %v2057_v0  ;;  %v292_v3 = vld [vmem:[%s254_s20 + $0x20] sm:$0xff]  ;;  %301 = vst [vmem:[%s2195_s19 + $0x28] sm:$0xff] %v293_v1  ;;  %303 = vst [vmem:[%s2195_s19 + $0x38] sm:$0xff] %v295_v2  ;;  %v307_v4 = vpack.c.bf16 %v295_v2, %v293_v1  ;;  %v294_v5 = vld [vmem:[%s254_s20 + $0x30] sm:$0xff]  ;;  %vm661_vm1 = vcmask 130048   ;;  %s1351_s18 = sld [smem:[#allocation4]] }
  0x33   : > { %1746 = vset.pattern.permute.xlu0 %v2057_v0  ;;  %742 = vmatprep.mubr.bf16.mxu0 %v2057_v0  ;;  %300 = vst [vmem:[%s2195_s19 + $0x20] sm:$0xff] %v292_v3  ;;  %v289_v6 = vld [vmem:[%s254_s20 + $0x8] sm:$0xff]  ;;  %v291_v7 = vld [vmem:[%s254_s20 + $0x18] sm:$0xff]  ;;  %302 = vst [vmem:[%s2195_s19 + $0x30] sm:$0xff] %v294_v5  ;;  %v306_v8 = vpack.c.bf16 %v294_v5, %v292_v3  ;;  %s1530_s10 = sshll.u32 %s2195_s19, 4  ;;  %s2058_s7 = smov [#allocation8]   ;;  %s2784_s10 = int_to_ptr.vmem [resolvable:$true] %s1530_s10 }
  0x34   : > { %297 = vst [vmem:[%s2195_s19 + $0x8] sm:$0xff] %v289_v6  ;;  %299 = vst [vmem:[%s2195_s19 + $0x18] sm:$0xff] %v291_v7  ;;  %v305_v9 = vpack.c.bf16 %v291_v7, %v289_v6  ;;  %v288_v10 = vld [vmem:[%s254_s20] sm:$0xff]  ;;  %v290_v11 = vld [vmem:[%s254_s20 + $0x10] sm:$0xff]  ;;  %367 = vmatprep.subr.bf16.mxu1 %v307_v4  ;;  %s1671_s20 = sshll.u32 %s2044_s26, 10  ;;  %s1517_s26 = scalar_lea.sflag [#allocation7], %s2183_s16 }
  0x35   : > { %296 = vst [vmem:[%s2195_s19] sm:$0xff] %v288_v10  ;;  %298 = vst [vmem:[%s2195_s19 + $0x10] sm:$0xff] %v290_v11  ;;  %368 = vmatpush1.bf16.msra.mxu1 %v306_v8  ;;  %v304_v12 = vpack.c.bf16 %v290_v11, %v288_v10  ;;  %v334_v13 = vld [vmem:[%s2838_s4] sm:$0xff]  ;;  %v335_v14 = vld [vmem:[%s2838_s4 + $0x8] sm:$0xff]  ;;  %s2782_s5 = scalar_lea.hbm %s2840_s6, %s1671_s20  ;;  %s1972_s29 = scalar_lea.vmem %s2784_s10, 1024 }
  0x36   : > { %369 = vmatprep.subr.bf16.mxu1 %v305_v9  ;;  %338 = vperm.xlu1 %1747, %v334_v13   ;;  %v425_v15 = vld [vmem:[%s2836_s2] sm:$0xff]  ;;  %v426_v17 = vld [vmem:[%s2836_s2 + $0x8] sm:$0xff]  ;;  %v427_v42 = vld [vmem:[%s2836_s2 + $0x10] sm:$0xff]  ;;  %p1973_p8 = scmp.ne.s32.totalorder %s2784_s10, %s1972_s29  ;;  %s1976_s9 = sshll.u32 %s2058_s7, 4  ;;  %s1977_s9 = int_to_ptr.vmem [resolvable:$false] %s1976_s9 }
  0x37   : > { %433 = vperm.xlu0 %1746, %v425_v15   ;;  %v1748_v16 = vld [vmem:[%s2837_s3] sm:$0xff]   ;;  %v1750_v19 = vld [vmem:[%s2835_s1 + $0x8] sm:$0xff]   ;;  %v1751_v43 = vld [vmem:[%s2835_s1 + $0x10] sm:$0xff]   ;;  %s1978_s15 = scalar_lea.vmem %s1977_s9, 2048  ;;  %p1979_p1 = scmp.lt.s32.totalorder %s2784_s10, %s1977_s9 }
  0x38   : > { %v1749_v18 = vld [vmem:[%s2835_s1] sm:$0xff]   ;;  %p1974_p12 = pnand %p1973_p8, %p2150_p9  ;;  %p1980_p3 = scmp.lt.s32.totalorder %s1978_s15, %s1972_s29 }
  0x39   : > { %370 = vmatpush1.bf16.msra.mxu1 %v304_v12 }
  0x3a   : > { %518 = vmatprep.subr.bf16.mxu1 %v307_v4  ;;  %343 = vperm.xlu1 %1747, %v335_v14   ;;  %p1975_p0 = pneg %p1974_p12  ;;  %p1981_p5 = por %p1980_p3, %p1979_p1 }
  0x3b   : > { %438 = vperm.xlu0 %1746, %v426_v17  }
  0x3c   : > { %1628 = vmatmul.mubr.msk.bf16.vlgmr.msra.gmra.mxu1 %vm351_vm0, %v1748_v16  ;;  %p1982_p6 = pnand %p1981_p5, %p1975_p0 }
  0x3d   : > { %519 = vmatpush1.bf16.msra.mxu1 %v306_v8  ;;  %538 = vmatprep.mubr.bf16.mxu1 %v2057_v0 }
  0x3e   : > { %520 = vmatprep.subr.bf16.mxu1 %v305_v9 }
  0x41   : > { %521 = vmatpush1.bf16.msra.mxu1 %v304_v12 }
  0x44   : > { %1638 = vmatmul.mubr.msk.bf16.vlgmr.msra.gmra.mxu1 %vm351_vm0, %v1749_v18 }
  0x45   : > { %548 = vmatprep.mubr.bf16.mxu1 %v2057_v0 }
  0x4c   : > { %1639 = vmatmul.mubr.msk.bf16.gmra.mxu1 %vm351_vm0, %v1750_v19 }
  0x4d   : > { %558 = vmatprep.mubr.bf16.mxu1 %v2057_v0 }
  0x54   : > { %1640 = vmatmul.mubr.msk.bf16.gmra.mxu1 %vm351_vm0, %v1751_v43  ;;  %v429_v43 = vld [vmem:[%s2836_s2 + $0x20] sm:$0xff] }
  0xb1   : > { %v339_v20 = vpop.permute.xlu1 %338 }
  0xb2   : > { %v434_v26 = vpop.permute.xlu0 %433 }
  0xb5   : > { %v344_v23 = vpop.permute.xlu1 %343 }
  0xb6   : > { %v439_v37 = vpop.permute.xlu0 %438 }
  0xfc   : > { %v389_v21 = vpop.f32.mrf.mxu1 }
  0xfd   : > { %v390_v30 = vadd.f32 %v389_v21, %v339_v20 }
  0xfe   : > { %v391_v22 = vpop.f32.mrf.mxu1 }
  0xff   : > { %v392_v28 = vadd.f32 %v391_v22, %v339_v20 }
 0x100   : > { %v393_v24 = vpop.f32.mrf.mxu1 }
 0x101   : > { %v394_v25 = vadd.f32 %v393_v24, %v344_v23 }
 0x102   : > { %v395_v27 = vpop.f32.mrf.mxu1 }
 0x103   : > { %v396_v29 = vadd.f32 %v395_v27, %v344_v23  ;;  %v1676_v35 = vpack.c.bf16 %v394_v25, %v390_v30 }
 0x104   : > { %v540_v31 = vpop.f32.mrf.mxu1 }
 0x105   : > { %v541_v32 = vadd.f32 %v540_v31, %v434_v26  ;;  %v1677_v33 = vpack.c.bf16 %v396_v29, %v392_v28 }
 0x106   : > { %v542_v34 = vpop.f32.mrf.mxu1 }
 0x107   : > { %v543_v36 = vadd.f32 %v542_v34, %v434_v26  ;;  %569 = vxpose.xlu0.b32.start [1/2] (short) %v541_v32, 128  ;;  %724 = vmatprep.subr.bf16.mxu0 %v1677_v33 }
 0x108   : > { %v544_v38 = vpop.f32.mrf.mxu1  ;;  %725 = vmatpush1.bf16.msra.mxu0 %v1676_v35 }
 0x109   : > { %v545_v39 = vadd.f32 %v544_v38, %v439_v37  ;;  %601 = vxpose.xlu1.b32.start [1/2] (short) %v543_v36, 128 }
 0x10a   : > { %v546_v40 = vpop.f32.mrf.mxu1 }
 0x10b   : > { %v547_v41 = vadd.f32 %v546_v40, %v439_v37  ;;  %570 = vxpose.xlu0.b32.end [2/2] (short) %v545_v39, 128 }
 0x10d   : > { %602 = vxpose.xlu1.b32.end [2/2] (short) %v547_v41, 128 }
 0x163   : > { %443 = vperm.xlu1 %1747, %v427_v42  }
 0x183   : > { %v585_v44 = vpop.trf.xlu0 }
 0x185   : > { %v617_v57 = vpop.trf.xlu1 }
 0x187   : > { %v586_v45 = vpop.trf.xlu0 }
 0x188   : > { %v633_v46 = vpack.c.bf16 %v586_v45, %v585_v44 }
 0x189   : > { %v618_v60 = vpop.trf.xlu1 }
 0x18a   : > { %1643 = vmatmul.mubr.msk.bf16.vlgmr.msra.gmra.mxu0 %vm661_vm1, %v633_v46  ;;  %v641_v11 = vpack.c.bf16 %v618_v60, %v617_v57 }
 0x18b   : > { %v587_v47 = vpop.trf.xlu0  ;;  %752 = vmatprep.mubr.bf16.mxu0 %v2057_v0 }
 0x18d   : > { %v619_v1 = vpop.trf.xlu1 }
 0x18f   : > { %v588_v48 = vpop.trf.xlu0 }
 0x190   : > { %v634_v49 = vpack.c.bf16 %v588_v48, %v587_v47  ;;  %v430_v47 = vld [vmem:[%s2836_s2 + $0x28] sm:$0xff] }
 0x191   : > { %v620_v3 = vpop.trf.xlu1 }
 0x192   : > { %1644 = vmatmul.mubr.msk.bf16.gmra.mxu0 %vm661_vm1, %v634_v49  ;;  %v642_v14 = vpack.c.bf16 %v620_v3, %v619_v1 }
 0x193   : > { %v589_v50 = vpop.trf.xlu0  ;;  %762 = vmatprep.mubr.bf16.mxu0 %v2057_v0 }
 0x195   : > { %v621_v7 = vpop.trf.xlu1 }
 0x197   : > { %v590_v51 = vpop.trf.xlu0 }
 0x198   : > { %v635_v52 = vpack.c.bf16 %v590_v51, %v589_v50 }
 0x199   : > { %v622_v10 = vpop.trf.xlu1 }
 0x19a   : > { %1645 = vmatmul.mubr.msk.bf16.gmra.mxu0 %vm661_vm1, %v635_v52  ;;  %v643_v16 = vpack.c.bf16 %v622_v10, %v621_v7 }
 0x19b   : > { %v591_v53 = vpop.trf.xlu0  ;;  %772 = vmatprep.mubr.bf16.mxu0 %v2057_v0 }
 0x19d   : > { %v623_v12 = vpop.trf.xlu1 }
 0x19f   : > { %v592_v54 = vpop.trf.xlu0 }
 0x1a0   : > { %v636_v55 = vpack.c.bf16 %v592_v54, %v591_v53 }
 0x1a1   : > { %v624_v13 = vpop.trf.xlu1 }
 0x1a2   : > { %1646 = vmatmul.mubr.msk.bf16.gmra.mxu0 %vm661_vm1, %v636_v55  ;;  %v644_v18 = vpack.c.bf16 %v624_v13, %v623_v12 }
 0x1a3   : > { %v593_v56 = vpop.trf.xlu0  ;;  %782 = vmatprep.mubr.bf16.mxu0 %v2057_v0 }
 0x1a5   : > { %v625_v15 = vpop.trf.xlu1 }
 0x1a7   : > { %v594_v58 = vpop.trf.xlu0 }
 0x1a8   : > { %v637_v59 = vpack.c.bf16 %v594_v58, %v593_v56 }
 0x1a9   : > { %v626_v17 = vpop.trf.xlu1 }
 0x1aa   : > { %1647 = vmatmul.mubr.msk.bf16.gmra.mxu0 %vm661_vm1, %v637_v59  ;;  %v645_v21 = vpack.c.bf16 %v626_v17, %v625_v15 }
 0x1ab   : > { %v595_v61 = vpop.trf.xlu0  ;;  %792 = vmatprep.mubr.bf16.mxu0 %v2057_v0 }
 0x1ad   : > { %v627_v19 = vpop.trf.xlu1 }
 0x1af   : > { %v596_v62 = vpop.trf.xlu0 }
 0x1b0   : > { %v638_v63 = vpack.c.bf16 %v596_v62, %v595_v61 }
 0x1b1   : > { %v628_v20 = vpop.trf.xlu1 }
 0x1b2   : > { %1648 = vmatmul.mubr.msk.bf16.gmra.mxu0 %vm661_vm1, %v638_v63  ;;  %v646_v23 = vpack.c.bf16 %v628_v20, %v627_v19 }
 0x1b3   : > { %v597_v2 = vpop.trf.xlu0  ;;  %802 = vmatprep.mubr.bf16.mxu0 %v2057_v0 }
 0x1b5   : > { %v629_v22 = vpop.trf.xlu1 }
 0x1b7   : > { %v598_v4 = vpop.trf.xlu0 }
 0x1b8   : > { %v639_v5 = vpack.c.bf16 %v598_v4, %v597_v2 }
 0x1b9   : > { %v630_v24 = vpop.trf.xlu1 }
 0x1ba   : > { %1649 = vmatmul.mubr.msk.bf16.gmra.mxu0 %vm661_vm1, %v639_v5  ;;  %v647_v25 = vpack.c.bf16 %v630_v24, %v629_v22 }
 0x1bb   : > { %v599_v6 = vpop.trf.xlu0  ;;  %812 = vmatprep.mubr.bf16.mxu0 %v2057_v0 }
 0x1bd   : > { %v631_v26 = vpop.trf.xlu1 }
 0x1bf   : > { %v600_v8 = vpop.trf.xlu0 }
 0x1c0   : > { %v640_v9 = vpack.c.bf16 %v600_v8, %v599_v6 }
 0x1c1   : > { %v632_v27 = vpop.trf.xlu1 }
 0x1c2   : > { %1650 = vmatmul.mubr.msk.bf16.gmra.mxu0 %vm661_vm1, %v640_v9  ;;  %v648_v28 = vpack.c.bf16 %v632_v27, %v631_v26 }
 0x1c3   : > { %822 = vmatprep.mubr.bf16.mxu0 %v2057_v0 }
 0x1ca   : > { %1651 = vmatmul.mubr.msk.bf16.gmra.mxu0 %vm661_vm1, %v641_v11 }
 0x1cb   : > { %832 = vmatprep.mubr.bf16.mxu0 %v2057_v0 }
 0x1d2   : > { %1652 = vmatmul.mubr.msk.bf16.gmra.mxu0 %vm661_vm1, %v642_v14 }
 0x1d3   : > { %842 = vmatprep.mubr.bf16.mxu0 %v2057_v0 }
 0x1da   : > { %1653 = vmatmul.mubr.msk.bf16.gmra.mxu0 %vm661_vm1, %v643_v16 }
 0x1db   : > { %852 = vmatprep.mubr.bf16.mxu0 %v2057_v0 }
 0x1e2   : > { %1654 = vmatmul.mubr.msk.bf16.gmra.mxu0 %vm661_vm1, %v644_v18 }
 0x1e3   : > { %862 = vmatprep.mubr.bf16.mxu0 %v2057_v0 }
 0x1ea   : > { %1655 = vmatmul.mubr.msk.bf16.gmra.mxu0 %vm661_vm1, %v645_v21 }
 0x1eb   : > { %872 = vmatprep.mubr.bf16.mxu0 %v2057_v0 }
 0x1f2   : > { %1656 = vmatmul.mubr.msk.bf16.gmra.mxu0 %vm661_vm1, %v646_v23 }
 0x1f3   : > { %882 = vmatprep.mubr.bf16.mxu0 %v2057_v0 }
 0x1fa   : > { %1657 = vmatmul.mubr.msk.bf16.gmra.mxu0 %vm661_vm1, %v647_v25 }
 0x1fb   : > { %892 = vmatprep.mubr.bf16.mxu0 %v2057_v0 }
 0x202   : > { %1658 = vmatmul.mubr.msk.bf16.gmra.mxu0 %vm661_vm1, %v648_v28 }
 0x24a   : > { %v2270_v29 = vpop.f32.mrf.mxu0 }
 0x24c   : > { %v2272_v30 = vpop.f32.mrf.mxu0 }
 0x24d   : > { %v903_v31 = vmax.f32 %v2270_v29, %v2272_v30 }
 0x24e   : > { %v2276_v32 = vpop.f32.mrf.mxu0 }
 0x24f   : > { %904 = vmax.xlane.f32.xlu1 %v903_v31 }
 0x250   : > { %v2278_v33 = vpop.f32.mrf.mxu0 }
 0x251   : > { %v906_v34 = vmax.f32 %v2276_v32, %v2278_v33 }
 0x252   : > { %v2282_v0 = vpop.f32.mrf.mxu0 }
 0x253   : > { %907 = vmax.xlane.f32.xlu0 %v906_v34 }
 0x254   : > { %v2284_v35 = vpop.f32.mrf.mxu0 }
 0x255   : > { %v909_v36 = vmax.f32 %v2282_v0, %v2284_v35 }
 0x256   : > { %v2288_v37 = vpop.f32.mrf.mxu0 }
 0x257   : > { %910 = vmax.xlane.f32.xlu0 %v909_v36 }
 0x258   : > { %v2290_v38 = vpop.f32.mrf.mxu0 }
 0x259   : > { %v912_v39 = vmax.f32 %v2288_v37, %v2290_v38 }
 0x25a   : > { %v2294_v40 = vpop.f32.mrf.mxu0 }
 0x25b   : > { %913 = vmax.xlane.f32.xlu0 %v912_v39 }
 0x25c   : > { %v2296_v41 = vpop.f32.mrf.mxu0 }
 0x25d   : > { %v915_v42 = vmax.f32 %v2294_v40, %v2296_v41 }
 0x25e   : > { %v2303_v44 = vpop.f32.mrf.mxu0 }
 0x25f   : > { %916 = vmax.xlane.f32.xlu0 %v915_v42 }
 0x260   : > { %453 = vperm.xlu1 %1747, %v429_v43   ;;  %v2305_v45 = vpop.f32.mrf.mxu0 }
 0x261   : > { %v918_v46 = vmax.f32 %v2303_v44, %v2305_v45 }
 0x262   : > { %v2312_v48 = vpop.f32.mrf.mxu0 }
 0x263   : > { %919 = vmax.xlane.f32.xlu0 %v918_v46 }
 0x264   : > { %458 = vperm.xlu1 %1747, %v430_v47   ;;  %v2314_v49 = vpop.f32.mrf.mxu0 }
 0x265   : > { %v921_v50 = vmax.f32 %v2312_v48, %v2314_v49 }
 0x266   : > { %v2318_v51 = vpop.f32.mrf.mxu0 }
 0x267   : > { %922 = vmax.xlane.f32.xlu0 %v921_v50  ;;  %v428_v50 = vld [vmem:[%s2836_s2 + $0x18] sm:$0xff] }
 0x268   : > { %v2320_v52 = vpop.f32.mrf.mxu0 }
 0x269   : > { %v924_v53 = vmax.f32 %v2318_v51, %v2320_v52 }
 0x26a   : > { %v2324_v54 = vpop.f32.mrf.mxu0 }
 0x26b   : > { %925 = vmax.xlane.f32.xlu0 %v924_v53 }
 0x26c   : > { %v2326_v55 = vpop.f32.mrf.mxu0 }
 0x26d   : > { %v927_v56 = vmax.f32 %v2324_v54, %v2326_v55 }
 0x26e   : > { %v2330_v57 = vpop.f32.mrf.mxu0 }
 0x26f   : > { %928 = vmax.xlane.f32.xlu0 %v927_v56 }
 0x270   : > { %v2332_v58 = vpop.f32.mrf.mxu0 }
 0x271   : > { %v930_v59 = vmax.f32 %v2330_v57, %v2332_v58 }
 0x272   : > { %v2336_v60 = vpop.f32.mrf.mxu0 }
 0x273   : > { %931 = vmax.xlane.f32.xlu0 %v930_v59 }
 0x274   : > { %v2338_v61 = vpop.f32.mrf.mxu0 }
 0x275   : > { %v933_v62 = vmax.f32 %v2336_v60, %v2338_v61 }
 0x276   : > { %v2342_v63 = vpop.f32.mrf.mxu0 }
 0x277   : > { %934 = vmax.xlane.f32.xlu0 %v933_v62 }
 0x278   : > { %v2344_v1 = vpop.f32.mrf.mxu0 }
 0x279   : > { %v936_v2 = vmax.f32 %v2342_v63, %v2344_v1 }
 0x27a   : > { %v2348_v3 = vpop.f32.mrf.mxu0 }
 0x27b   : > { %937 = vmax.xlane.f32.xlu0 %v936_v2 }
 0x27c   : > { %v2350_v4 = vpop.f32.mrf.mxu0 }
 0x27d   : > { %v939_v5 = vmax.f32 %v2348_v3, %v2350_v4 }
 0x27e   : > { %v2354_v6 = vpop.f32.mrf.mxu0 }
 0x27f   : > { %940 = vmax.xlane.f32.xlu0 %v939_v5 }
 0x280   : > { %v2356_v7 = vpop.f32.mrf.mxu0 }
 0x281   : > { %v942_v8 = vmax.f32 %v2354_v6, %v2356_v7 }
 0x282   : > { %v2360_v9 = vpop.f32.mrf.mxu0 }
 0x283   : > { %943 = vmax.xlane.f32.xlu0 %v942_v8 }
 0x284   : > { %v2362_v10 = vpop.f32.mrf.mxu0 }
 0x285   : > { %v945_v11 = vmax.f32 %v2360_v9, %v2362_v10 }
 0x286   : > { %v2366_v12 = vpop.f32.mrf.mxu0 }
 0x287   : > { %946 = vmax.xlane.f32.xlu0 %v945_v11 }
 0x288   : > { %v2368_v13 = vpop.f32.mrf.mxu0 }
 0x289   : > { %v948_v14 = vmax.f32 %v2366_v12, %v2368_v13 }
 0x28a   : > { %v2372_v15 = vpop.f32.mrf.mxu0 }
 0x28b   : > { %949 = vmax.xlane.f32.xlu0 %v948_v14 }
 0x28c   : > { %v2374_v16 = vpop.f32.mrf.mxu0 }
 0x28d   : > { %v951_v17 = vmax.f32 %v2372_v15, %v2374_v16 }
 0x28e   : > { %v2378_v18 = vpop.f32.mrf.mxu0 }
 0x28f   : > { %952 = vmax.xlane.f32.xlu0 %v951_v17 }
 0x290   : > { %v2380_v19 = vpop.f32.mrf.mxu0 }
 0x291   : > { %v954_v20 = vmax.f32 %v2378_v18, %v2380_v19 }
 0x292   : > { %v2384_v21 = vpop.f32.mrf.mxu0 }
 0x293   : > { %955 = vmax.xlane.f32.xlu0 %v954_v20 }
 0x294   : > { %v2386_v22 = vpop.f32.mrf.mxu0 }
 0x295   : > { %v957_v23 = vmax.f32 %v2384_v21, %v2386_v22 }
 0x296   : > { %v2390_v24 = vpop.f32.mrf.mxu0 }
 0x297   : > { %958 = vmax.xlane.f32.xlu1 %v957_v23 }
 0x298   : > { %v2392_v25 = vpop.f32.mrf.mxu0 }
 0x299   : > { %v960_v26 = vmax.f32 %v2390_v24, %v2392_v25 }
 0x29a   : > { %v2396_v27 = vpop.f32.mrf.mxu0 }
 0x29b   : > { %961 = vmax.xlane.f32.xlu1 %v960_v26 }
 0x29c   : > { %v2398_v28 = vpop.f32.mrf.mxu0 }
 0x29d   : > { %v963_v31 = vmax.f32 %v2396_v27, %v2398_v28 }
 0x29e   : > { %v2402_v34 = vpop.f32.mrf.mxu0 }
 0x29f   : > { %964 = vmax.xlane.f32.xlu1 %v963_v31 }
 0x2a0   : > { %v2404_v36 = vpop.f32.mrf.mxu0 }
 0x2a1   : > { %v966_v39 = vmax.f32 %v2402_v34, %v2404_v36 }
 0x2a2   : > { %v2408_v42 = vpop.f32.mrf.mxu0 }
 0x2a3   : > { %967 = vmax.xlane.f32.xlu1 %v966_v39 }
 0x2a4   : > { %v2410_v43 = vpop.f32.mrf.mxu0 }
 0x2a5   : > { %v969_v46 = vmax.f32 %v2408_v42, %v2410_v43 }
 0x2a6   : > { %v2414_v47 = vpop.f32.mrf.mxu0 }
 0x2a7   : > { %970 = vmax.xlane.f32.xlu1 %v969_v46 }
 0x2a8   : > { %v2419_v53 = vpop.f32.mrf.mxu0 }
 0x2a9   : > { %448 = vperm.xlu0 %1746, %v428_v50   ;;  %v972_v56 = vmax.f32 %v2414_v47, %v2419_v53 }
 0x2aa   : > { %v2423_v59 = vpop.f32.mrf.mxu0 }
 0x2ab   : > { %973 = vmax.xlane.f32.xlu1 %v972_v56 }
 0x2ac   : > { %v2425_v62 = vpop.f32.mrf.mxu0 }
 0x2ad   : > { %v975_v2 = vmax.f32 %v2423_v59, %v2425_v62 }
 0x2ae   : > { %v2429_v5 = vpop.f32.mrf.mxu0 }
 0x2af   : > { %2860 = vst [vmem:[#allocation11_spill] sm:$0xff] %v2429_v5  ;;  %976 = vmax.xlane.f32.xlu1 %v975_v2 }
 0x2b0   : > { %v2431_v8 = vpop.f32.mrf.mxu0 }
 0x2b1   : > { %2861 = vst [vmem:[#allocation12_spill] sm:$0xff] %v2431_v8  ;;  %v978_v11 = vmax.f32 %v2429_v5, %v2431_v8 }
 0x2b2   : > { %v2435_v14 = vpop.f32.mrf.mxu0 }
 0x2b3   : > { %2862 = vst [vmem:[#allocation13_spill] sm:$0xff] %v2435_v14  ;;  %979 = vmax.xlane.f32.xlu1 %v978_v11 }
 0x2b4   : > { %v2437_v17 = vpop.f32.mrf.mxu0 }
 0x2b5   : > { %2863 = vst [vmem:[#allocation14_spill] sm:$0xff] %v2437_v17  ;;  %v981_v20 = vmax.f32 %v2435_v14, %v2437_v17 }
 0x2b6   : > { %v2441_v23 = vpop.f32.mrf.mxu0 }
 0x2b7   : > { %2864 = vst [vmem:[#allocation15_spill] sm:$0xff] %v2441_v23  ;;  %982 = vmax.xlane.f32.xlu1 %v981_v20 }
 0x2b8   : > { %v2443_v26 = vpop.f32.mrf.mxu0 }
 0x2b9   : > { %2865 = vst [vmem:[#allocation16_spill] sm:$0xff] %v2443_v26  ;;  %v984_v31 = vmax.f32 %v2441_v23, %v2443_v26 }
 0x2ba   : > { %v2447_v39 = vpop.f32.mrf.mxu0 }
 0x2bb   : > { %2866 = vst [vmem:[#allocation17_spill] sm:$0xff] %v2447_v39  ;;  %985 = vmax.xlane.f32.xlu1 %v984_v31 }
 0x2bc   : > { %v2449_v46 = vpop.f32.mrf.mxu0 }
 0x2bd   : > { %2867 = vst [vmem:[#allocation18_spill] sm:$0xff] %v2449_v46  ;;  %v987_v50 = vmax.f32 %v2447_v39, %v2449_v46  ;;  %v2471_v39 = vpop.permute.xlu1 %443 }
 0x2be   : > { %v2453_v56 = vpop.f32.mrf.mxu0  ;;  %2873 = vst [vmem:[#allocation24_spill] sm:$0xff] %v2471_v39 }
 0x2bf   : > { %2868 = vst [vmem:[#allocation19_spill] sm:$0xff] %v2453_v56  ;;  %988 = vmax.xlane.f32.xlu1 %v987_v50 }
 0x2c0   : > { %v2455_v2 = vpop.f32.mrf.mxu0 }
 0x2c1   : > { %2869 = vst [vmem:[#allocation20_spill] sm:$0xff] %v2455_v2  ;;  %v990_v11 = vmax.f32 %v2453_v56, %v2455_v2 }
 0x2c2   : > { %v2459_v20 = vpop.f32.mrf.mxu0 }
 0x2c3   : > { %2870 = vst [vmem:[#allocation21_spill] sm:$0xff] %v2459_v20  ;;  %991 = vmax.xlane.f32.xlu1 %v990_v11 }
 0x2c4   : > { %v2461_v26 = vpop.f32.mrf.mxu0 }
 0x2c5   : > { %2871 = vst [vmem:[#allocation22_spill] sm:$0xff] %v2461_v26  ;;  %v993_v31 = vmax.f32 %v2459_v20, %v2461_v26 }
 0x2c6   : > { %v2465_v23 = vpop.f32.mrf.mxu0 }
 0x2c7   : > { %994 = vmax.xlane.f32.xlu1 %v993_v31 }
 0x2c8   : > { %v2467_v46 = vpop.f32.mrf.mxu0 }
 0x2c9   : > { %2872 = vst [vmem:[#allocation23_spill] sm:$0xff] %v2467_v46  ;;  %v996_v50 = vmax.f32 %v2465_v23, %v2467_v46 }
 0x2cb   : > { %997 = vmax.xlane.f32.xlu1 %v996_v50 }
 0x2d8   : > { %v905_v2 = vpop.xlane.xlu1 %904 }
 0x2d9   : > { %v999_v56 = vsub.f32 %v2270_v29, %v905_v2  ;;  %v1000_v11 = vsub.f32 %v2272_v30, %v905_v2 }
 0x2db   : > { %v1063_v17 = vmul.f32 1.442695, %v999_v56  ;;  %v1065_v14 = vmul.f32 1.442695, %v1000_v11 }
 0x2dc   : > { %v908_v8 = vpop.xlane.xlu0 %907 }
 0x2dd   : > { %1752 = vpow2.f32 %v1063_v17  ;;  %v1001_v26 = vsub.f32 %v2276_v32, %v908_v8  ;;  %v1002_v31 = vsub.f32 %v2278_v33, %v908_v8 }
 0x2de   : > { %1754 = vpow2.f32 %v1065_v14 }
 0x2df   : > { %v1067_v20 = vmul.f32 1.442695, %v1001_v26  ;;  %v1069_v5 = vmul.f32 1.442695, %v1002_v31 }
 0x2e0   : > { %v911_v46 = vpop.xlane.xlu0 %910 }
 0x2e1   : > { %1756 = vpow2.f32 %v1067_v20  ;;  %v1003_v50 = vsub.f32 %v2282_v0, %v911_v46  ;;  %v1004_v29 = vsub.f32 %v2284_v35, %v911_v46 }
 0x2e2   : > { %1758 = vpow2.f32 %v1069_v5 }
 0x2e3   : > { %v1071_v39 = vmul.f32 1.442695, %v1003_v50  ;;  %v1073_v30 = vmul.f32 1.442695, %v1004_v29 }
 0x2e4   : > { %v914_v56 = vpop.xlane.xlu0 %913 }
 0x2e5   : > { %1760 = vpow2.f32 %v1071_v39  ;;  %v1005_v17 = vsub.f32 %v2288_v37, %v914_v56  ;;  %v1006_v32 = vsub.f32 %v2290_v38, %v914_v56 }
 0x2e6   : > { %1762 = vpow2.f32 %v1073_v30 }
 0x2e7   : > { %v1075_v14 = vmul.f32 1.442695, %v1005_v17  ;;  %v1077_v33 = vmul.f32 1.442695, %v1006_v32 }
 0x2e8   : > { %v917_v8 = vpop.xlane.xlu0 %916 }
 0x2e9   : > { %1764 = vpow2.f32 %v1075_v14  ;;  %v1007_v26 = vsub.f32 %v2294_v40, %v917_v8  ;;  %v1008_v0 = vsub.f32 %v2296_v41, %v917_v8 }
 0x2ea   : > { %v2483_v5 = vpop.eup %1752  ;;  %1766 = vpow2.f32 %v1077_v33 }
 0x2eb   : > { %v2485_v35 = vpop.eup %1754  ;;  %v1079_v46 = vmul.f32 1.442695, %v1007_v26  ;;  %v1081_v39 = vmul.f32 1.442695, %v1008_v0 }
 0x2ec   : > { %v920_v2 = vpop.xlane.xlu0 %919  ;;  %v1191_v37 = vadd.f32 %v2485_v35, %v2483_v5 }
 0x2ed   : > { %1768 = vpow2.f32 %v1079_v46  ;;  %v1009_v38 = vsub.f32 %v2303_v44, %v920_v2  ;;  %v1010_v20 = vsub.f32 %v2305_v45, %v920_v2 }
 0x2ee   : > { %v2491_v11 = vpop.eup %1756  ;;  %1770 = vpow2.f32 %v1081_v39  ;;  %1192 = vadd.xlane.f32.xlu0 %v1191_v37 }
 0x2ef   : > { %v2493_v40 = vpop.eup %1758  ;;  %v1083_v41 = vmul.f32 1.442695, %v1009_v38  ;;  %v1085_v31 = vmul.f32 1.442695, %v1010_v20 }
 0x2f0   : > { %v923_v29 = vpop.xlane.xlu0 %922  ;;  %v1194_v30 = vadd.f32 %v2493_v40, %v2491_v11 }
 0x2f1   : > { %1772 = vpow2.f32 %v1083_v41  ;;  %v1011_v45 = vsub.f32 %v2312_v48, %v923_v29  ;;  %v1012_v56 = vsub.f32 %v2314_v49, %v923_v29 }
 0x2f2   : > { %v2503_v17 = vpop.eup %1760  ;;  %1774 = vpow2.f32 %v1085_v31  ;;  %1195 = vadd.xlane.f32.xlu0 %v1194_v30 }
 0x2f3   : > { %v2505_v32 = vpop.eup %1762  ;;  %v1087_v14 = vmul.f32 1.442695, %v1011_v45  ;;  %v1089_v33 = vmul.f32 1.442695, %v1012_v56 }
 0x2f4   : > { %v926_v8 = vpop.xlane.xlu0 %925  ;;  %v1197_v26 = vadd.f32 %v2505_v32, %v2503_v17 }
 0x2f5   : > { %1776 = vpow2.f32 %v1087_v14  ;;  %v1013_v0 = vsub.f32 %v2318_v51, %v926_v8  ;;  %v1014_v46 = vsub.f32 %v2320_v52, %v926_v8 }
 0x2f6   : > { %v2511_v48 = vpop.eup %1764  ;;  %1778 = vpow2.f32 %v1089_v33  ;;  %1198 = vadd.xlane.f32.xlu0 %v1197_v26 }
 0x2f7   : > { %v2513_v49 = vpop.eup %1766  ;;  %v1091_v39 = vmul.f32 1.442695, %v1013_v0  ;;  %v1093_v2 = vmul.f32 1.442695, %v1014_v46 }
 0x2f8   : > { %v929_v38 = vpop.xlane.xlu0 %928  ;;  %v1200_v20 = vadd.f32 %v2513_v49, %v2511_v48  ;;  %v1322_v51 = vpack.c.bf16 %v2513_v49, %v2505_v32 }
 0x2f9   : > { %1780 = vpow2.f32 %v1091_v39  ;;  %v1015_v52 = vsub.f32 %v2324_v54, %v929_v38  ;;  %v1016_v41 = vsub.f32 %v2326_v55, %v929_v38 }
 0x2fa   : > { %v2523_v31 = vpop.eup %1768  ;;  %1782 = vpow2.f32 %v1093_v2  ;;  %1201 = vadd.xlane.f32.xlu0 %v1200_v20 }
 0x2fb   : > { %v2525_v29 = vpop.eup %1770  ;;  %v1095_v30 = vmul.f32 1.442695, %v1015_v52  ;;  %v1097_v45 = vmul.f32 1.442695, %v1016_v41 }
 0x2fc   : > { %v932_v56 = vpop.xlane.xlu0 %931  ;;  %v1203_v14 = vadd.f32 %v2525_v29, %v2523_v31 }
 0x2fd   : > { %1784 = vpow2.f32 %v1095_v30  ;;  %v1017_v33 = vsub.f32 %v2330_v57, %v932_v56  ;;  %v1018_v8 = vsub.f32 %v2332_v58, %v932_v56 }
 0x2fe   : > { %v2531_v54 = vpop.eup %1772  ;;  %1786 = vpow2.f32 %v1097_v45  ;;  %1204 = vadd.xlane.f32.xlu0 %v1203_v14 }
 0x2ff   : > { %v2533_v55 = vpop.eup %1774  ;;  %v1099_v26 = vmul.f32 1.442695, %v1017_v33  ;;  %v1101_v0 = vmul.f32 1.442695, %v1018_v8  ;;  %v1323_v46 = vpack.c.bf16 %v2531_v54, %v2523_v31 }
 0x300   : > { %v935_v39 = vpop.xlane.xlu0 %934  ;;  %v1206_v2 = vadd.f32 %v2533_v55, %v2531_v54  ;;  %v1324_v57 = vpack.c.bf16 %v2533_v55, %v2525_v29 }
 0x301   : > { %1788 = vpow2.f32 %v1099_v26  ;;  %v1019_v58 = vsub.f32 %v2336_v60, %v935_v39  ;;  %v1020_v38 = vsub.f32 %v2338_v61, %v935_v39 }
 0x302   : > { %v2543_v20 = vpop.eup %1776  ;;  %1790 = vpow2.f32 %v1101_v0  ;;  %1207 = vadd.xlane.f32.xlu0 %v1206_v2 }
 0x303   : > { %v2545_v52 = vpop.eup %1778  ;;  %v1103_v41 = vmul.f32 1.442695, %v1019_v58  ;;  %v1105_v30 = vmul.f32 1.442695, %v1020_v38 }
 0x304   : > { %v938_v45 = vpop.xlane.xlu0 %937  ;;  %v1209_v56 = vadd.f32 %v2545_v52, %v2543_v20 }
 0x305   : > { %1792 = vpow2.f32 %v1103_v41  ;;  %v1021_v14 = vsub.f32 %v2342_v63, %v938_v45  ;;  %v1022_v33 = vsub.f32 %v2344_v1, %v938_v45 }
 0x306   : > { %v2551_v60 = vpop.eup %1780  ;;  %1794 = vpow2.f32 %v1105_v30  ;;  %1210 = vadd.xlane.f32.xlu0 %v1209_v56 }
 0x307   : > { %v2553_v61 = vpop.eup %1782  ;;  %v1107_v8 = vmul.f32 1.442695, %v1021_v14  ;;  %v1109_v26 = vmul.f32 1.442695, %v1022_v33 }
 0x308   : > { %v941_v0 = vpop.xlane.xlu0 %940  ;;  %v1212_v39 = vadd.f32 %v2553_v61, %v2551_v60 }
 0x309   : > { %1796 = vpow2.f32 %v1107_v8  ;;  %v1023_v2 = vsub.f32 %v2348_v3, %v941_v0  ;;  %v1024_v58 = vsub.f32 %v2350_v4, %v941_v0 }
 0x30a   : > { %v2559_v63 = vpop.eup %1784  ;;  %1798 = vpow2.f32 %v1109_v26  ;;  %1213 = vadd.xlane.f32.xlu0 %v1212_v39 }
 0x30b   : > { %v2561_v1 = vpop.eup %1786  ;;  %v1111_v38 = vmul.f32 1.442695, %v1023_v2  ;;  %v1113_v41 = vmul.f32 1.442695, %v1024_v58 }
 0x30c   : > { %v944_v30 = vpop.xlane.xlu0 %943  ;;  %v1215_v45 = vadd.f32 %v2561_v1, %v2559_v63 }
 0x30d   : > { %1800 = vpow2.f32 %v1111_v38  ;;  %v1025_v56 = vsub.f32 %v2354_v6, %v944_v30  ;;  %v1026_v14 = vsub.f32 %v2356_v7, %v944_v30 }
 0x30e   : > { %v2567_v3 = vpop.eup %1788  ;;  %1802 = vpow2.f32 %v1113_v41  ;;  %1216 = vadd.xlane.f32.xlu0 %v1215_v45 }
 0x30f   : > { %v2569_v4 = vpop.eup %1790  ;;  %v1115_v33 = vmul.f32 1.442695, %v1025_v56  ;;  %v1117_v8 = vmul.f32 1.442695, %v1026_v14 }
 0x310   : > { %v947_v26 = vpop.xlane.xlu0 %946  ;;  %v1218_v0 = vadd.f32 %v2569_v4, %v2567_v3 }
 0x311   : > { %1804 = vpow2.f32 %v1115_v33  ;;  %v1027_v39 = vsub.f32 %v2360_v9, %v947_v26  ;;  %v1028_v2 = vsub.f32 %v2362_v10, %v947_v26  ;;  %v2585_v10 = vpop.permute.xlu1 %453 }
 0x312   : > { %v2575_v6 = vpop.eup %1792  ;;  %1806 = vpow2.f32 %v1117_v8  ;;  %1219 = vadd.xlane.f32.xlu0 %v1218_v0 }
 0x313   : > { %v2577_v7 = vpop.eup %1794  ;;  %v1119_v58 = vmul.f32 1.442695, %v1027_v39  ;;  %v1121_v38 = vmul.f32 1.442695, %v1028_v2 }
 0x314   : > { %v950_v41 = vpop.xlane.xlu0 %949  ;;  %v1221_v30 = vadd.f32 %v2577_v7, %v2575_v6 }
 0x315   : > { %1808 = vpow2.f32 %v1119_v58  ;;  %v1029_v45 = vsub.f32 %v2366_v12, %v950_v41  ;;  %v1030_v56 = vsub.f32 %v2368_v13, %v950_v41  ;;  %v2595_v41 = vpop.permute.xlu1 %458 }
 0x316   : > { %v2583_v9 = vpop.eup %1796  ;;  %1810 = vpow2.f32 %v1121_v38  ;;  %1222 = vadd.xlane.f32.xlu0 %v1221_v30 }
 0x317   : > { %v2587_v14 = vpop.eup %1798  ;;  %v1123_v33 = vmul.f32 1.442695, %v1029_v45  ;;  %v1125_v8 = vmul.f32 1.442695, %v1030_v56 }
 0x318   : > { %v953_v26 = vpop.xlane.xlu0 %952  ;;  %v1224_v0 = vadd.f32 %v2587_v14, %v2583_v9 }
 0x319   : > { %1812 = vpow2.f32 %v1123_v33  ;;  %v1031_v39 = vsub.f32 %v2372_v15, %v953_v26  ;;  %v1032_v12 = vsub.f32 %v2374_v16, %v953_v26 }
 0x31a   : > { %v2593_v13 = vpop.eup %1800  ;;  %1814 = vpow2.f32 %v1125_v8  ;;  %1225 = vadd.xlane.f32.xlu0 %v1224_v0 }
 0x31b   : > { %v1803_v2 = vpop.eup %1802  ;;  %v1127_v58 = vmul.f32 1.442695, %v1031_v39  ;;  %v1129_v38 = vmul.f32 1.442695, %v1032_v12 }
 0x31c   : > { %v956_v30 = vpop.xlane.xlu0 %955  ;;  %v1227_v45 = vadd.f32 %v1803_v2, %v2593_v13 }
 0x31d   : > { %1816 = vpow2.f32 %v1127_v58  ;;  %v1033_v56 = vsub.f32 %v2378_v18, %v956_v30  ;;  %v1034_v33 = vsub.f32 %v2380_v19, %v956_v30 }
 0x31e   : > { %v1805_v15 = vpop.eup %1804  ;;  %1818 = vpow2.f32 %v1129_v38  ;;  %1228 = vadd.xlane.f32.xlu0 %v1227_v45 }
 0x31f   : > { %v1807_v16 = vpop.eup %1806  ;;  %v1131_v26 = vmul.f32 1.442695, %v1033_v56  ;;  %v1133_v8 = vmul.f32 1.442695, %v1034_v33 }
 0x320   : > { %v959_v0 = vpop.xlane.xlu1 %958  ;;  %v1230_v50 = vadd.f32 %v1807_v16, %v1805_v15 }
 0x321   : > { %1820 = vpow2.f32 %v1131_v26  ;;  %v1035_v39 = vsub.f32 %v2384_v21, %v959_v0  ;;  %v1036_v12 = vsub.f32 %v2386_v22, %v959_v0 }
 0x322   : > { %v1809_v44 = vpop.eup %1808  ;;  %1822 = vpow2.f32 %v1133_v8  ;;  %1231 = vadd.xlane.f32.xlu0 %v1230_v50 }
 0x323   : > { %v1811_v58 = vpop.eup %1810  ;;  %v1135_v18 = vmul.f32 1.442695, %v1035_v39  ;;  %v1137_v37 = vmul.f32 1.442695, %v1036_v12 }
 0x324   : > { %v962_v19 = vpop.xlane.xlu1 %961  ;;  %v1233_v30 = vadd.f32 %v1811_v58, %v1809_v44 }
 0x325   : > { %1824 = vpow2.f32 %v1135_v18  ;;  %v1037_v38 = vsub.f32 %v2390_v24, %v962_v19  ;;  %v1038_v56 = vsub.f32 %v2392_v25, %v962_v19  ;;  %v1332_v24 = vpack.c.bf16 %v1807_v16, %v1803_v2 }
 0x326   : > { %v1813_v45 = vpop.eup %1812  ;;  %1826 = vpow2.f32 %v1137_v37  ;;  %1234 = vadd.xlane.f32.xlu0 %v1233_v30  ;;  %v1331_v30 = vpack.c.bf16 %v1805_v15, %v2593_v13  ;;  %v1330_v2 = vpack.c.bf16 %v2587_v14, %v2577_v7  ;;  %v1329_v14 = vpack.c.bf16 %v2583_v9, %v2575_v6 }
 0x327   : > { %v1815_v33 = vpop.eup %1814  ;;  %v1139_v21 = vmul.f32 1.442695, %v1037_v38  ;;  %v1333_v26 = vpack.c.bf16 %v1813_v45, %v1809_v44  ;;  %v1141_v22 = vmul.f32 1.442695, %v1038_v56  ;;  %v1327_v9 = vpack.c.bf16 %v2567_v3, %v2559_v63 }
 0x328   : > { %v965_v0 = vpop.xlane.xlu1 %964  ;;  %v1334_v8 = vpack.c.bf16 %v1815_v33, %v1811_v58  ;;  %v1236_v50 = vadd.f32 %v1815_v33, %v1813_v45 }
 0x329   : > { %1828 = vpow2.f32 %v1139_v21  ;;  %v1039_v39 = vsub.f32 %v2396_v27, %v965_v0  ;;  %v1040_v12 = vsub.f32 %v2398_v28, %v965_v0 }
 0x32a   : > { %v2606_v18 = vpop.eup %1816  ;;  %1830 = vpow2.f32 %v1141_v22  ;;  %1447 = vmatprep.subr.bf16.mxu1 %v1334_v8  ;;  %1237 = vadd.xlane.f32.xlu0 %v1236_v50 }
 0x32b   : > { %v2608_v25 = vpop.eup %1818  ;;  %v1143_v37 = vmul.f32 1.442695, %v1039_v39  ;;  %v1145_v19 = vmul.f32 1.442695, %v1040_v12  ;;  %1448 = vmatpush1.bf16.msra.mxu1 %v1333_v26  ;;  %v1328_v26 = vpack.c.bf16 %v2569_v4, %v2561_v1  ;;  %v1326_v1 = vpack.c.bf16 %v2553_v61, %v2545_v52 }
 0x32c   : > { %1449 = vmatprep.subr.bf16.mxu1 %v1332_v24  ;;  %v968_v44 = vpop.xlane.xlu1 %967  ;;  %v1239_v58 = vadd.f32 %v2608_v25, %v2606_v18  ;;  %v1325_v61 = vpack.c.bf16 %v2551_v60, %v2543_v20  ;;  %v2875_v60 = vld [vmem:[#allocation12_spill] sm:$0xff] }
 0x32d   : > { %1832 = vpow2.f32 %v1143_v37  ;;  %v1041_v27 = vsub.f32 %v2402_v34, %v968_v44  ;;  %v1042_v28 = vsub.f32 %v2404_v36, %v968_v44 }
 0x32e   : > { %v2615_v38 = vpop.eup %1820  ;;  %1834 = vpow2.f32 %v1145_v19  ;;  %1240 = vadd.xlane.f32.xlu1 %v1239_v58 }
 0x32f   : > { %v2619_v16 = vpop.eup %1822  ;;  %v1147_v45 = vmul.f32 1.442695, %v1041_v27  ;;  %v1149_v56 = vmul.f32 1.442695, %v1042_v28  ;;  %1450 = vmatpush1.bf16.msra.mxu1 %v1331_v30  ;;  %v1335_v33 = vpack.c.bf16 %v2615_v38, %v2606_v18 }
 0x330   : > { %1451 = vmatprep.subr.bf16.mxu1 %v1330_v2  ;;  %v971_v34 = vpop.xlane.xlu1 %970  ;;  %v1242_v36 = vadd.f32 %v2619_v16, %v2615_v38  ;;  %v1336_v13 = vpack.c.bf16 %v2619_v16, %v2608_v25 }
 0x331   : > { %1836 = vpow2.f32 %v1147_v45  ;;  %v1043_v15 = vsub.f32 %v2408_v42, %v971_v34  ;;  %v1044_v7 = vsub.f32 %v2410_v43, %v971_v34 }
 0x332   : > { %v2631_v21 = vpop.eup %1824  ;;  %1838 = vpow2.f32 %v1149_v56  ;;  %1243 = vadd.xlane.f32.xlu1 %v1242_v36 }
 0x333   : > { %v2635_v22 = vpop.eup %1826  ;;  %v1151_v0 = vmul.f32 1.442695, %v1043_v15  ;;  %v1153_v8 = vmul.f32 1.442695, %v1044_v7  ;;  %1452 = vmatpush1.bf16.msra.mxu1 %v1329_v14  ;;  %v2876_v15 = vld [vmem:[#allocation13_spill] sm:$0xff]  ;;  %v2877_v14 = vld [vmem:[#allocation14_spill] sm:$0xff] }
 0x334   : > { %1453 = vmatprep.subr.bf16.mxu1 %v1328_v26  ;;  %v974_v50 = vpop.xlane.xlu1 %973  ;;  %v1245_v42 = vadd.f32 %v2635_v22, %v2631_v21  ;;  %v2879_v26 = vpack.c.bf16 %v2493_v40, %v2485_v35  ;;  %v2882_v35 = vpack.c.bf16 %v2491_v11, %v2483_v5  ;;  %v2885_v11 = vld [vmem:[#allocation19_spill] sm:$0xff] }
 0x335   : > { %1840 = vpow2.f32 %v1151_v0  ;;  %v1045_v43 = vsub.f32 %v2414_v47, %v974_v50  ;;  %v1046_v6 = vsub.f32 %v2419_v53, %v974_v50  ;;  %v2880_v50 = vld [vmem:[#allocation15_spill] sm:$0xff] }
 0x336   : > { %v2643_v39 = vpop.eup %1828  ;;  %1842 = vpow2.f32 %v1153_v8  ;;  %1246 = vadd.xlane.f32.xlu1 %v1245_v42 }
 0x337   : > { %v2647_v4 = vpop.eup %1830  ;;  %v1155_v12 = vmul.f32 1.442695, %v1045_v43  ;;  %v1157_v24 = vmul.f32 1.442695, %v1046_v6  ;;  %1454 = vmatpush1.bf16.msra.mxu1 %v1327_v9  ;;  %v1337_v47 = vpack.c.bf16 %v2643_v39, %v2631_v21  ;;  %v2881_v43 = vld [vmem:[#allocation16_spill] sm:$0xff] }
 0x338   : > { %1455 = vmatprep.subr.bf16.mxu1 %v1326_v1  ;;  %v977_v53 = vpop.xlane.xlu1 %976  ;;  %v1248_v63 = vadd.f32 %v2647_v4, %v2643_v39  ;;  %v1338_v3 = vpack.c.bf16 %v2647_v4, %v2635_v22 }
 0x339   : > { %1844 = vpow2.f32 %v1155_v12  ;;  %v1047_v37 = vsub.f32 %v2423_v59, %v977_v53  ;;  %v1048_v52 = vsub.f32 %v2425_v62, %v977_v53  ;;  %v2874_v62 = vld [vmem:[#allocation11_spill] sm:$0xff] }
 0x33a   : > { %v2659_v19 = vpop.eup %1832  ;;  %1846 = vpow2.f32 %v1157_v24  ;;  %1249 = vadd.xlane.f32.xlu1 %v1248_v63  ;;  %v2883_v24 = vld [vmem:[#allocation17_spill] sm:$0xff]  ;;  %v2884_v63 = vld [vmem:[#allocation18_spill] sm:$0xff] }
 0x33b   : > { %v2661_v44 = vpop.eup %1834  ;;  %v1159_v58 = vmul.f32 1.442695, %v1047_v37  ;;  %v1161_v27 = vmul.f32 1.442695, %v1048_v52  ;;  %1456 = vmatpush1.bf16.msra.mxu1 %v1325_v61 }
 0x33c   : > { %1457 = vmatprep.subr.bf16.mxu1 %v1324_v57  ;;  %v980_v28 = vpop.xlane.xlu1 %979  ;;  %v1251_v59 = vadd.f32 %v2661_v44, %v2659_v19 }
 0x33d   : > { %1848 = vpow2.f32 %v1159_v58  ;;  %v1049_v20 = vsub.f32 %v2874_v62, %v980_v28  ;;  %v1050_v30 = vsub.f32 %v2875_v60, %v980_v28  ;;  %v2886_v62 = vld [vmem:[#allocation20_spill] sm:$0xff] }
 0x33e   : > { %v2670_v2 = vpop.eup %1836  ;;  %1850 = vpow2.f32 %v1161_v27  ;;  %1252 = vadd.xlane.f32.xlu1 %v1251_v59 }
 0x33f   : > { %v2672_v45 = vpop.eup %1838  ;;  %v1163_v56 = vmul.f32 1.442695, %v1049_v20  ;;  %v1165_v34 = vmul.f32 1.442695, %v1050_v30  ;;  %1458 = vmatpush1.bf16.msra.mxu1 %v1323_v46  ;;  %v1339_v29 = vpack.c.bf16 %v2670_v2, %v2659_v19 }
 0x340   : > { %1459 = vmatprep.subr.bf16.mxu1 %v1322_v51  ;;  %v983_v55 = vpop.xlane.xlu1 %982  ;;  %v1254_v57 = vadd.f32 %v2672_v45, %v2670_v2  ;;  %v1340_v36 = vpack.c.bf16 %v2672_v45, %v2661_v44  ;;  %v2878_v51 = vpack.c.bf16 %v2511_v48, %v2503_v17 }
 0x341   : > { %1852 = vpow2.f32 %v1163_v56  ;;  %v1051_v7 = vsub.f32 %v2876_v15, %v983_v55  ;;  %v1052_v31 = vsub.f32 %v2877_v14, %v983_v55  ;;  %v2887_v15 = vld [vmem:[#allocation21_spill] sm:$0xff]  ;;  %v2888_v14 = vld [vmem:[#allocation22_spill] sm:$0xff] }
 0x342   : > { %v2688_v54 = vpop.eup %1840  ;;  %1854 = vpow2.f32 %v1165_v34  ;;  %1255 = vadd.xlane.f32.xlu1 %v1254_v57 }
 0x343   : > { %v2690_v46 = vpop.eup %1842  ;;  %v1167_v32 = vmul.f32 1.442695, %v1051_v7  ;;  %v1169_v49 = vmul.f32 1.442695, %v1052_v31  ;;  %1460 = vmatpush1.bf16.msra.mxu1 %v2878_v51 }
 0x344   : > { %1461 = vmatprep.subr.bf16.mxu1 %v2879_v26  ;;  %v986_v0 = vpop.xlane.xlu1 %985  ;;  %v1257_v8 = vadd.f32 %v2690_v46, %v2688_v54 }
 0x345   : > { %1856 = vpow2.f32 %v1167_v32  ;;  %v1053_v42 = vsub.f32 %v2880_v50, %v986_v0  ;;  %v1054_v6 = vsub.f32 %v2881_v43, %v986_v0 }
 0x346   : > { %v2702_v9 = vpop.eup %1844  ;;  %1858 = vpow2.f32 %v1169_v49  ;;  %1258 = vadd.xlane.f32.xlu1 %v1257_v8 }
 0x347   : > { %v2704_v1 = vpop.eup %1846  ;;  %v1171_v17 = vmul.f32 1.442695, %v1053_v42  ;;  %v1173_v48 = vmul.f32 1.442695, %v1054_v6  ;;  %1462 = vmatpush1.bf16.msra.mxu1 %v2882_v35  ;;  %v2889_v42 = vld [vmem:[#allocation23_spill] sm:$0xff] }
 0x348   : > { %v989_v40 = vpop.xlane.xlu1 %988  ;;  %v1260_v12 = vadd.f32 %v2704_v1, %v2702_v9 }
 0x349   : > { %1860 = vpow2.f32 %v1171_v17  ;;  %v1055_v53 = vsub.f32 %v2883_v24, %v989_v40  ;;  %v1056_v37 = vsub.f32 %v2884_v63, %v989_v40 }
 0x34a   : > { %v2713_v52 = vpop.eup %1848  ;;  %1862 = vpow2.f32 %v1173_v48  ;;  %1261 = vadd.xlane.f32.xlu1 %v1260_v12 }
 0x34b   : > { %v2715_v61 = vpop.eup %1850  ;;  %v1175_v58 = vmul.f32 1.442695, %v1055_v53  ;;  %v1177_v27 = vmul.f32 1.442695, %v1056_v37 }
 0x34c   : > { %v992_v28 = vpop.xlane.xlu1 %991  ;;  %v1263_v5 = vadd.f32 %v2715_v61, %v2713_v52 }
 0x34d   : > { %1864 = vpow2.f32 %v1175_v58  ;;  %v1057_v59 = vsub.f32 %v2885_v11, %v992_v28  ;;  %v1058_v20 = vsub.f32 %v2886_v62, %v992_v28 }
 0x34e   : > { %v2721_v60 = vpop.eup %1852  ;;  %1866 = vpow2.f32 %v1177_v27  ;;  %1264 = vadd.xlane.f32.xlu1 %v1263_v5 }
 0x34f   : > { %v1855_v30 = vpop.eup %1854  ;;  %v1179_v56 = vmul.f32 1.442695, %v1057_v59  ;;  %v1181_v34 = vmul.f32 1.442695, %v1058_v20 }
 0x350   : > { %v995_v55 = vpop.xlane.xlu1 %994  ;;  %v1266_v57 = vadd.f32 %v1855_v30, %v2721_v60 }
 0x351   : > { %1868 = vpow2.f32 %v1179_v56  ;;  %v1059_v7 = vsub.f32 %v2887_v15, %v995_v55  ;;  %v1060_v31 = vsub.f32 %v2888_v14, %v995_v55  ;;  %v1344_v15 = vpack.c.bf16 %v1855_v30, %v2715_v61 }
 0x352   : > { %v1857_v32 = vpop.eup %1856  ;;  %1870 = vpow2.f32 %v1181_v34  ;;  %1267 = vadd.xlane.f32.xlu1 %v1266_v57  ;;  %v1343_v14 = vpack.c.bf16 %v2721_v60, %v2713_v52 }
 0x353   : > { %v1859_v49 = vpop.eup %1858  ;;  %v1183_v51 = vmul.f32 1.442695, %v1059_v7  ;;  %v1185_v26 = vmul.f32 1.442695, %v1060_v31  ;;  %v2729_v7 = vpop.permute.xlu0 %448  ;;  %v1342_v31 = vpack.c.bf16 %v2704_v1, %v2690_v46 }
 0x354   : > { %v998_v0 = vpop.xlane.xlu1 %997  ;;  %v1269_v8 = vadd.f32 %v1859_v49, %v1857_v32 }
 0x355   : > { %1872 = vpow2.f32 %v1183_v51  ;;  %v1061_v50 = vsub.f32 %v2465_v23, %v998_v0  ;;  %v1062_v43 = vsub.f32 %v2889_v42, %v998_v0 }
 0x356   : > { %v1861_v6 = vpop.eup %1860  ;;  %1874 = vpow2.f32 %v1185_v26  ;;  %1270 = vadd.xlane.f32.xlu1 %v1269_v8 }
 0x357   : > { %v1863_v17 = vpop.eup %1862  ;;  %v1187_v48 = vmul.f32 1.442695, %v1061_v50  ;;  %v1189_v35 = vmul.f32 1.442695, %v1062_v43  ;;  %v1345_v57 = vpack.c.bf16 %v1861_v6, %v1857_v32 }
 0x358   : > { %v1272_v40 = vadd.f32 %v1863_v17, %v1861_v6  ;;  %v1346_v55 = vpack.c.bf16 %v1863_v17, %v1859_v49  ;;  %v1341_v49 = vpack.c.bf16 %v2702_v9, %v2688_v54 }
 0x359   : > { %1876 = vpow2.f32 %v1187_v48 }
 0x35a   : > { %v1865_v12 = vpop.eup %1864  ;;  %1878 = vpow2.f32 %v1189_v35  ;;  %1273 = vadd.xlane.f32.xlu1 %v1272_v40 }
 0x35b   : > { %v1867_v24 = vpop.eup %1866 }
 0x35c   : > { %v1275_v53 = vadd.f32 %v1867_v24, %v1865_v12 }
 0x35e   : > { %v1869_v63 = vpop.eup %1868  ;;  %1276 = vadd.xlane.f32.xlu1 %v1275_v53 }
 0x35f   : > { %v1871_v37 = vpop.eup %1870  ;;  %v1347_v34 = vpack.c.bf16 %v1869_v63, %v1865_v12 }
 0x360   : > { %v1278_v58 = vadd.f32 %v1871_v37, %v1869_v63  ;;  %v1348_v56 = vpack.c.bf16 %v1871_v37, %v1867_v24 }
 0x362   : > { %v1873_v23 = vpop.eup %1872  ;;  %1279 = vadd.xlane.f32.xlu1 %v1278_v58 }
 0x363   : > { %v1875_v27 = vpop.eup %1874 }
 0x364   : > { %v1281_v28 = vadd.f32 %v1875_v27, %v1873_v23 }
 0x366   : > { %v1877_v5 = vpop.eup %1876  ;;  %1282 = vadd.xlane.f32.xlu1 %v1281_v28 }
 0x367   : > { %v1879_v11 = vpop.eup %1878  ;;  %v1349_v59 = vpack.c.bf16 %v1877_v5, %v1873_v23 }
 0x368   : > { %v1350_v62 = vpack.c.bf16 %v1879_v11, %v1875_v27  ;;  %v1284_v20 = vadd.f32 %v1879_v11, %v1877_v5 }
 0x36a   : > { %1463 = vmatprep.subr.bf16.mxu1 %v1350_v62  ;;  %1285 = vadd.xlane.f32.xlu1 %v1284_v20 }
 0x36b   : > { %1464 = vmatpush2.bf16.msra.mxu1 %v1349_v59 }
 0x36c   : > { %1465 = vmatprep.subr.bf16.mxu1 %v1348_v56 }
 0x36f   : > { %1466 = vmatpush2.bf16.msra.mxu1 %v1347_v34 }
 0x370   : > { %1467 = vmatprep.subr.bf16.mxu1 %v1346_v55 }
 0x373   : > { %1468 = vmatpush2.bf16.msra.mxu1 %v1345_v57 }
 0x374   : > { %1469 = vmatprep.subr.bf16.mxu1 %v1344_v15 }
 0x377   : > { %v1193_v51 = vpop.xlane.xlu0 %1192  ;;  %1470 = vmatpush2.bf16.msra.mxu1 %v1343_v14 }
 0x378   : > { %1471 = vmatprep.subr.bf16.mxu1 %v1342_v31  ;;  %1880 = vrcp.f32 %v1193_v51 }
 0x37b   : > { %v1196_v26 = vpop.xlane.xlu0 %1195  ;;  %1472 = vmatpush2.bf16.msra.mxu1 %v1341_v49 }
 0x37c   : > { %1473 = vmatprep.subr.bf16.mxu1 %v1340_v36  ;;  %1882 = vrcp.f32 %v1196_v26 }
 0x37f   : > { %v1199_v61 = vpop.xlane.xlu0 %1198  ;;  %1474 = vmatpush2.bf16.msra.mxu1 %v1339_v29 }
 0x380   : > { %1475 = vmatprep.subr.bf16.mxu1 %v1338_v3  ;;  %1884 = vrcp.f32 %v1199_v61 }
 0x383   : > { %v1202_v46 = vpop.xlane.xlu0 %1201  ;;  %1476 = vmatpush2.bf16.msra.mxu1 %v1337_v47 }
 0x384   : > { %1477 = vmatprep.subr.bf16.mxu1 %v1336_v13  ;;  %1886 = vrcp.f32 %v1202_v46  ;;  %v550_v46 = vpop.f32.mrf.mxu1 }
 0x385   : > { %v1881_v4 = vpop.eup %1880 }
 0x387   : > { %v1205_v44 = vpop.xlane.xlu0 %1204  ;;  %1478 = vmatpush2.bf16.msra.mxu1 %v1335_v33 }
 0x388   : > { %1888 = vrcp.f32 %v1205_v44  ;;  %v552_v44 = vpop.f32.mrf.mxu1 }
 0x389   : > { %v1883_v39 = vpop.eup %1882 }
 0x38b   : > { %v1208_v19 = vpop.xlane.xlu0 %1207 }
 0x38c   : > { %1890 = vrcp.f32 %v1208_v19  ;;  %v554_v19 = vpop.f32.mrf.mxu1 }
 0x38d   : > { %v1885_v25 = vpop.eup %1884 }
 0x38f   : > { %v1211_v2 = vpop.xlane.xlu0 %1210 }
 0x390   : > { %1892 = vrcp.f32 %v1211_v2  ;;  %v556_v2 = vpop.f32.mrf.mxu1 }
 0x391   : > { %v1887_v18 = vpop.eup %1886 }
 0x393   : > { %v1214_v22 = vpop.xlane.xlu0 %1213 }
 0x394   : > { %1894 = vrcp.f32 %v1214_v22  ;;  %v1419_v22 = vlaneseq }
 0x395   : > { %v1889_v33 = vpop.eup %1888 }
 0x397   : > { %v1217_v21 = vpop.xlane.xlu0 %1216 }
 0x398   : > { %1896 = vrcp.f32 %v1217_v21  ;;  %v1420_v21 = vshrl.u32 %v1419_v22, 7 }
 0x399   : > { %v1891_v13 = vpop.eup %1890 }
 0x39b   : > { %v1220_v16 = vpop.xlane.xlu0 %1219 }
 0x39c   : > { %1898 = vrcp.f32 %v1220_v16  ;;  %v1421_v16 = vsub.s32 0, %v1420_v21 }
 0x39d   : > { %1352 = vxpose.xlu1.b32.start [1/16] (narrow) %v1881_v4, 8  ;;  %v1893_v3 = vpop.eup %1892  ;;  %v560_v4 = vpop.f32.mrf.mxu1 }
 0x39f   : > { %v1223_v38 = vpop.xlane.xlu0 %1222 }
 0x3a0   : > { %1900 = vrcp.f32 %v1223_v38 }
 0x3a1   : > { %1353 = vxpose.xlu1.b32.cont [2/16] (narrow) %v1883_v39, 8  ;;  %v1895_v36 = vpop.eup %1894  ;;  %v562_v39 = vpop.f32.mrf.mxu1 }
 0x3a3   : > { %v1226_v47 = vpop.xlane.xlu0 %1225 }
 0x3a5   : > { %1354 = vxpose.xlu1.b32.cont [3/16] (narrow) %v1885_v25, 8  ;;  %v1897_v9 = vpop.eup %1896  ;;  %v1416_v25 = vstv %s1351_s18 }
 0x3a7   : > { %v1229_v45 = vpop.xlane.xlu0 %1228 }
 0x3a9   : > { %1355 = vxpose.xlu1.b32.cont [4/16] (narrow) %v1887_v18, 8  ;;  %v1899_v60 = vpop.eup %1898 }
 0x3ab   : > { %v1232_v1 = vpop.xlane.xlu0 %1231 }
 0x3ad   : > { %1356 = vxpose.xlu1.b32.cont [5/16] (narrow) %v1889_v33, 8  ;;  %v1901_v0 = vpop.eup %1900  ;;  %v564_v33 = vpop.f32.mrf.mxu1 }
 0x3af   : > { %v1235_v30 = vpop.xlane.xlu0 %1234 }
 0x3b1   : > { %1357 = vxpose.xlu1.b32.cont [6/16] (narrow) %v1891_v13, 8  ;;  %v561_v13 = vadd.f32 %v560_v4, %v2585_v10 }
 0x3b3   : > { %v1238_v43 = vpop.xlane.xlu0 %1237 }
 0x3b5   : > { %1358 = vxpose.xlu1.b32.cont [7/16] (narrow) %v1893_v3, 8 }
 0x3b7   : > { %v1241_v29 = vpop.xlane.xlu1 %1240 }
 0x3b8   : > { %1902 = vrcp.f32 %v1241_v29 }
 0x3b9   : > { %1359 = vxpose.xlu1.b32.cont [8/16] (narrow) %v1895_v36, 8  ;;  %1904 = vrcp.f32 %v1226_v47  ;;  %v565_v47 = vadd.f32 %v564_v33, %v2595_v41 }
 0x3bb   : > { %v1244_v54 = vpop.xlane.xlu1 %1243 }
 0x3bc   : > { %1906 = vrcp.f32 %v1244_v54  ;;  %v566_v54 = vpop.f32.mrf.mxu1 }
 0x3bd   : > { %1360 = vxpose.xlu1.b32.cont [9/16] (narrow) %v1897_v9, 8  ;;  %1908 = vrcp.f32 %v1229_v45 }
 0x3bf   : > { %v1247_v52 = vpop.xlane.xlu1 %1246 }
 0x3c0   : > { %1910 = vrcp.f32 %v1247_v52  ;;  %v2890_v52 = vld [vmem:[#allocation24_spill] sm:$0xff] }
 0x3c1   : > { %1361 = vxpose.xlu1.b32.cont [10/16] (narrow) %v1899_v60, 8  ;;  %1912 = vrcp.f32 %v1232_v1  ;;  %v551_v60 = vadd.f32 %v550_v46, %v2890_v52 }
 0x3c3   : > { %v1250_v32 = vpop.xlane.xlu1 %1249 }
 0x3c4   : > { %1914 = vrcp.f32 %v1250_v32  ;;  %v555_v32 = vadd.f32 %v554_v19, %v2729_v7 }
 0x3c5   : > { %v1903_v8 = vpop.eup %1902  ;;  %1362 = vxpose.xlu1.b32.cont [11/16] (narrow) %v1901_v0, 8  ;;  %1916 = vrcp.f32 %v1235_v30  ;;  %v553_v30 = vadd.f32 %v552_v44, %v2890_v52  ;;  %v563_v0 = vadd.f32 %v562_v39, %v2585_v10 }
 0x3c6   : > { %1384 = vxpose.xlu0.b32.start [1/16] (narrow) %v1903_v8, 8  ;;  %v1905_v42 = vpop.eup %1904  ;;  %v567_v8 = vadd.f32 %v566_v54, %v2595_v41  ;;  %v1435_v41 = vld [vmem:[%s2195_s19] sm:$0xff] }
 0x3c7   : > { %v1253_v50 = vpop.xlane.xlu1 %1252 }
 0x3c8   : > { %1918 = vrcp.f32 %v1253_v50  ;;  %v557_v50 = vadd.f32 %v556_v2, %v2729_v7 }
 0x3c9   : > { %v1907_v6 = vpop.eup %1906  ;;  %1363 = vxpose.xlu1.b32.cont [12/16] (narrow) %v1905_v42, 8  ;;  %1920 = vrcp.f32 %v1238_v43 }
 0x3ca   : > { %1385 = vxpose.xlu0.b32.cont [2/16] (narrow) %v1907_v6, 8  ;;  %v1909_v48 = vpop.eup %1908 }
 0x3cb   : > { %v1256_v17 = vpop.xlane.xlu1 %1255 }
 0x3cc   : > { %1922 = vrcp.f32 %v1256_v17 }
 0x3cd   : > { %v1911_v35 = vpop.eup %1910  ;;  %1364 = vxpose.xlu1.b32.cont [13/16] (narrow) %v1909_v48, 8 }
 0x3ce   : > { %1386 = vxpose.xlu0.b32.cont [3/16] (narrow) %v1911_v35, 8  ;;  %v1913_v12 = vpop.eup %1912 }
 0x3cf   : > { %v1259_v40 = vpop.xlane.xlu1 %1258 }
 0x3d0   : > { %1924 = vrcp.f32 %v1259_v40 }
 0x3d1   : > { %v1915_v24 = vpop.eup %1914  ;;  %1365 = vxpose.xlu1.b32.cont [14/16] (narrow) %v1913_v12, 8 }
 0x3d2   : > { %1387 = vxpose.xlu0.b32.cont [4/16] (narrow) %v1915_v24, 8  ;;  %v1917_v63 = vpop.eup %1916 }
 0x3d3   : > { %v1262_v53 = vpop.xlane.xlu1 %1261 }
 0x3d4   : > { %1926 = vrcp.f32 %v1262_v53  ;;  %v1436_v53 = vld [vmem:[%s2195_s19 + $0x8] sm:$0xff] }
 0x3d5   : > { %v1919_v37 = vpop.eup %1918  ;;  %1366 = vxpose.xlu1.b32.cont [15/16] (narrow) %v1917_v63, 8 }
 0x3d6   : > { %1388 = vxpose.xlu0.b32.cont [5/16] (narrow) %v1919_v37, 8  ;;  %v1921_v23 = vpop.eup %1920 }
 0x3d7   : > { %v1265_v58 = vpop.xlane.xlu1 %1264 }
 0x3d8   : > { %1928 = vrcp.f32 %v1265_v58  ;;  %v1437_v58 = vld [vmem:[%s2195_s19 + $0x10] sm:$0xff] }
 0x3d9   : > { %v1923_v27 = vpop.eup %1922  ;;  %1367 = vxpose.xlu1.b32.end [16/16] (narrow) %v1921_v23, 8 }
 0x3da   : > { %1389 = vxpose.xlu0.b32.cont [6/16] (narrow) %v1923_v27, 8 }
 0x3db   : > { %v1268_v28 = vpop.xlane.xlu1 %1267 }
 0x3dc   : > { %1930 = vrcp.f32 %v1268_v28  ;;  %v1438_v28 = vld [vmem:[%s2195_s19 + $0x18] sm:$0xff] }
 0x3dd   : > { %v1925_v5 = vpop.eup %1924 }
 0x3de   : > { %1390 = vxpose.xlu0.b32.cont [7/16] (narrow) %v1925_v5, 8 }
 0x3df   : > { %v1271_v11 = vpop.xlane.xlu1 %1270 }
 0x3e0   : > { %1932 = vrcp.f32 %v1271_v11 }
 0x3e1   : > { %v1927_v59 = vpop.eup %1926 }
 0x3e2   : > { %1391 = vxpose.xlu0.b32.cont [8/16] (narrow) %v1927_v59, 8  ;;  %v1439_v59 = vld [vmem:[%s2195_s19 + $0x20] sm:$0xff] }
 0x3e3   : > { %v1274_v62 = vpop.xlane.xlu1 %1273 }
 0x3e4   : > { %1934 = vrcp.f32 %v1274_v62 }
 0x3e5   : > { %v1929_v20 = vpop.eup %1928 }
 0x3e6   : > { %1392 = vxpose.xlu0.b32.cont [9/16] (narrow) %v1929_v20, 8 }
 0x3e7   : > { %v1277_v56 = vpop.xlane.xlu1 %1276 }
 0x3e8   : > { %1936 = vrcp.f32 %v1277_v56  ;;  %v1440_v56 = vld [vmem:[%s2195_s19 + $0x28] sm:$0xff] }
 0x3e9   : > { %v1931_v34 = vpop.eup %1930 }
 0x3ea   : > { %1393 = vxpose.xlu0.b32.cont [10/16] (narrow) %v1931_v34, 8 }
 0x3eb   : > { %v1280_v55 = vpop.xlane.xlu1 %1279 }
 0x3ec   : > { %1938 = vrcp.f32 %v1280_v55 }
 0x3ed   : > { %v1933_v57 = vpop.eup %1932 }
 0x3ee   : > { %1394 = vxpose.xlu0.b32.cont [11/16] (narrow) %v1933_v57, 8  ;;  %v1441_v57 = vld [vmem:[%s2195_s19 + $0x30] sm:$0xff] }
 0x3ef   : > { %v1283_v15 = vpop.xlane.xlu1 %1282 }
 0x3f0   : > { %1940 = vrcp.f32 %v1283_v15 }
 0x3f1   : > { %v1935_v14 = vpop.eup %1934 }
 0x3f2   : > { %1395 = vxpose.xlu0.b32.cont [12/16] (narrow) %v1935_v14, 8 }
 0x3f3   : > { %v1286_v31 = vpop.xlane.xlu1 %1285 }
 0x3f4   : > { %1942 = vrcp.f32 %v1286_v31  ;;  %v1442_v31 = vld [vmem:[%s2195_s19 + $0x38] sm:$0xff] }
 0x3f5   : > { %v1937_v51 = vpop.eup %1936 }
 0x3f6   : > { %1396 = vxpose.xlu0.b32.cont [13/16] (narrow) %v1937_v51, 8 }
 0x3f9   : > { %v1939_v49 = vpop.eup %1938 }
 0x3fa   : > { %1397 = vxpose.xlu0.b32.cont [14/16] (narrow) %v1939_v49, 8 }
 0x3fd   : > { %v1941_v26 = vpop.eup %1940 }
 0x3fe   : > { %1398 = vxpose.xlu0.b32.cont [15/16] (narrow) %v1941_v26, 8 }
 0x401   : > { %v1943_v61 = vpop.eup %1942 }
 0x402   : > { %1399 = vxpose.xlu0.b32.end [16/16] (narrow) %v1943_v61, 8 }
 0x419   : > { %v1368_v18 = vpop.trf.xlu1 }
 0x41a   : > { %v1417_v38 = vmul.f32 %v1416_v25, %v1368_v18 }
 0x41c   : > { %v1422_v3 = vrot.slane %v1417_v38, %v1421_v16 }
 0x41e   : > { %v1431_v45 = vmul.f32 %v1422_v3, %v561_v13  ;;  %v1433_v29 = vmul.f32 %v1422_v3, %v565_v47  ;;  %v1427_v43 = vmul.f32 %v1422_v3, %v551_v60  ;;  %v1429_v6 = vmul.f32 %v1422_v3, %v555_v32 }
 0x420   : > { %v1445_v36 = vpack.c.bf16 %v1433_v29, %v1431_v45  ;;  %v1443_v10 = vpack.c.bf16 %v1429_v6, %v1427_v43 }
 0x442   : > { %v1400_v9 = vpop.trf.xlu0 }
 0x443   : > { %v1418_v1 = vmul.f32 %v1416_v25, %v1400_v9 }
 0x445   : > { %v1426_v42 = vrot.slane %v1418_v1, %v1421_v16 }
 0x447   : > { %v1428_v17 = vmul.f32 %v1426_v42, %v553_v30  ;;  %v1430_v48 = vmul.f32 %v1426_v42, %v557_v50  ;;  %v1432_v35 = vmul.f32 %v1426_v42, %v563_v0  ;;  %v1434_v40 = vmul.f32 %v1426_v42, %v567_v8 }
 0x449   : > { %v1444_v12 = vpack.c.bf16 %v1430_v48, %v1428_v17  ;;  %v1446_v24 = vpack.c.bf16 %v1434_v40, %v1432_v35 }
 0x44b   : > { %1479 = vmatprep.mubr.bf16.mxu1 %v1444_v12 }
 0x44c   : > { %1480 = vmatmul.mubr.bf16.vlgmr.msra.gmra.mxu1 %v1443_v10 }
 0x44d   : > { %1489 = vmatprep.mubr.bf16.mxu1 %v1446_v24 }
 0x454   : > { %1490 = vmatmul.mubr.bf16.gmra.mxu1 %v1445_v36 }
 0x50c   : > { %v1481_v7 = vpop.f32.mrf.mxu1 }
 0x50d   : > { %v1500_v63 = vadd.f32 %v1481_v7, %v1435_v41 }
 0x50e   : > { %v1483_v37 = vpop.f32.mrf.mxu1 }
 0x50f   : > { %1508 = vst [vmem:[%s2195_s19] sm:$0xff] %v1500_v63  ;;  %v1501_v23 = vadd.f32 %v1483_v37, %v1436_v53 }
 0x510   : > { %v1485_v27 = vpop.f32.mrf.mxu1 }
 0x511   : > { %1509 = vst [vmem:[%s2195_s19 + $0x8] sm:$0xff] %v1501_v23  ;;  %v1502_v5 = vadd.f32 %v1485_v27, %v1437_v58 }
 0x512   : > { %v1487_v11 = vpop.f32.mrf.mxu1 }
 0x513   : > { %1510 = vst [vmem:[%s2195_s19 + $0x10] sm:$0xff] %v1502_v5  ;;  %v1503_v62 = vadd.f32 %v1487_v11, %v1438_v28 }
 0x514   : > { %v1491_v20 = vpop.f32.mrf.mxu1 }
 0x515   : > { %1511 = vst [vmem:[%s2195_s19 + $0x18] sm:$0xff] %v1503_v62  ;;  %v1504_v34 = vadd.f32 %v1491_v20, %v1439_v59 }
 0x516   : > { %v1493_v55 = vpop.f32.mrf.mxu1 }
 0x517   : > { %1512 = vst [vmem:[%s2195_s19 + $0x20] sm:$0xff] %v1504_v34  ;;  %v1505_v15 = vadd.f32 %v1493_v55, %v1440_v56 }
 0x518   : > { %v1495_v14 = vpop.f32.mrf.mxu1 }
 0x519   : > { %1513 = vst [vmem:[%s2195_s19 + $0x28] sm:$0xff] %v1505_v15  ;;  %v1506_v51 = vadd.f32 %v1495_v14, %v1441_v57 }
 0x51a   : > { %v1497_v49 = vpop.f32.mrf.mxu1 }
 0x51b   : > { %1514 = vst [vmem:[%s2195_s19 + $0x30] sm:$0xff] %v1506_v51  ;;  %v1507_v26 = vadd.f32 %v1497_v49, %v1442_v31 }
 0x51d   : > { %1515 = vst [vmem:[%s2195_s19 + $0x38] sm:$0xff] %v1507_v26 }
 0x51e   : > { %1985 = shalt.err (!%p1982_p6)
}
 0x51f   : > { %s1986_s19 = scalar_lea.hbm %s2782_s5, 1024  ;;  %s1990_s17 = scalar_lea.hbm %s2840_s6, 2048 }
 0x520   : > { %p1987_p7 = scmp.ne.s32.totalorder %s2782_s5, %s1986_s19  ;;  %p1991_p13 = scmp.lt.s32.totalorder %s2782_s5, %s2840_s6 }
 0x521   : > { %p1992_p2 = scmp.lt.s32.totalorder %s1990_s17, %s1986_s19 }
 0x522   : > { %p1988_p10 = pnand %p1987_p7, %p2150_p9 }
 0x523   : > { %p1993_p8 = por %p1992_p2, %p1991_p13 }
 0x524   : > { %p1989_p4 = pneg %p1988_p10 }
 0x526   : > { %p1994_p12 = pnand %p1993_p8, %p1989_p4 }
 0x528   : > { %1997 = shalt.err (!%p1994_p12)
}
 0x529   : > { %s2059_s21 = smov 256   ;;  %s2060_s22 = smov 16  }
 0x52a   : > { %1680 = dma.vmem_to_hbm [thread:$0]  (%p2150_p9), %s2784_s10, 1024, %s2782_s5, %s1517_s26, %s2059_s21, %s2059_s21, %s2060_s22  }
 0x52b PF: > { %s1545_s29 = sand.u32 1, %s2032_s23   ;;  %p2891_p0 = scmp.ge.s32.totalorder %s2052_s28, 2 }
 0x52c   : > { %s1546_s7 = scalar_lea.sflag [#allocation7], %s1545_s29 }
 0x52d   : > { %p1687_p1 = pnand %p2891_p0, %p2157_p11 }
 0x52f   : > { %p1688_p3 = pneg %p1687_p1 }
 0x531   : > { %2027 = dma.done.wait (%p1688_p3), %s1546_s7, 1024  }
 0x532   : > { %2029 = vsyncadd (%p1688_p3), %s1546_s7, 4294966272  ;;  %s23_s28 = sadd.s32 1, %s2052_s28   ;;  %s2892_s23 = smov %s2036_s24 }
 0x533   : > { %p20_p5 = scmp.ge.s32.totalorder %s23_s28, 4   ;;  %s2893_s24 = smov %s2040_s25 }
 0x534   : > { %s2894_s25 = smov %s2155_s12  ;;  %s2895_s26 = smov %s2048_s27 }
 0x535   : > { %s2896_s27 = smov %s2898_s30  ;;  %22 = sbr.rel (!%p20_p5) target bundleno = 8 (0x8), region = 94 }
 0x53a   :  { %1551 = vsyncpa [#allocation6], 1 }
 0x53b   :  { %1553 = vsyncpa [#allocation6 + $0x1], 1 }
 0x53c   :  { %1554 = vsyncpa [#allocation7], 1 }
 0x53d   :  { %1556 = vsyncpa [#allocation7 + $0x1], 1 }

</bundles_post_ra>
